<compile_context>
chip_gen: v7x
topology: tpu7x:2x2x1
jax: 0.10.0
libtpu: 0.0.40
codegen_flags: <defaults>
</compile_context>

<pallas_src>
import functools
import math

import jax
import jax.numpy as jnp
from jax import lax
from jax.experimental import pallas as pl
from jax.experimental.pallas import tpu as pltpu


def _tokenchange_kernel(x_t_ref, x_f_ref, wt_ref, b_ref, out_t_ref, out_f_ref,
                        *, k, norm_fact, sim_dtype):
    Bn, L, D = x_t_ref.shape

    xt = x_t_ref[...]                      # (Bn, L, D) original tokens
    xf = x_f_ref[...]
    wt = wt_ref[...].astype(sim_dtype)     # (D, D) = W^T, VMEM-resident across grid
    bias = b_ref[...]                      # (1, D) f32

    # Shared nn.Linear projection: the whole block is folded into the matmul M dim.
    def project(x):
        x2 = x.reshape(Bn * L, D).astype(sim_dtype)
        xp = jnp.dot(x2, wt, preferred_element_type=jnp.float32) + bias
        return xp.reshape(Bn, L, D)        # f32

    xt_p = project(xt)
    xf_p = project(xf)

    row = lax.broadcasted_iota(jnp.int32, (L, L), 0)
    col = lax.broadcasted_iota(jnp.int32, (L, L), 1)
    is_diag = row == col                   # bool mask; no f32 eye/offdiag buffers

    def col_scores(xp):
        # logits[b,i,j] = (norm_fact * xp[b,i]) . xp[b,j]  (scale on the (L,D) operand)
        lhs = (xp * norm_fact).astype(sim_dtype)
        rhs = xp.astype(sim_dtype)
        logits = jnp.einsum('bid,bjd->bij', lhs, rhs,
                            preferred_element_type=jnp.float32)          # (Bn, L, L)
        m = jnp.max(logits, axis=-1, keepdims=True)
        e = jnp.exp(logits - m)
        denom = jnp.sum(e, axis=-1, keepdims=True)                       # (Bn, L, 1)
        inv = pl.reciprocal(denom, approx=True)                          # EUP slot
        inv = inv * (2.0 - denom * inv)    # one Newton step: f32-accurate, still no VPU divide
        att = jnp.where(is_diag, 0.0, e * inv)                           # softmax, diag zeroed
        s_row = jnp.sum(att, axis=1, keepdims=True)                      # (Bn, 1, L) column sums
        # Exact (Bn,1,L) -> (Bn,L,1) relayout: keep only the diagonal of the
        # broadcast and lane-reduce (bit-identical to s_row; no identity matmul,
        # no extra (L,L) f32 scratch).
        s_col = jnp.sum(jnp.where(is_diag, s_row, 0.0), axis=-1, keepdims=True)
        return s_row, s_col

    def bottomk_mask(s_row, s_col):
        # counts[i] = #{j : s[j] <= s[i]};  k-th smallest = min{ s[i] : counts[i] >= k }.
        le = s_row <= s_col                                              # (Bn, L, L) bool
        counts = jnp.sum(le.astype(jnp.int32), axis=-1, keepdims=True)   # (Bn, L, 1)
        cand = jnp.where(counts >= k, s_col, jnp.float32(3.0e38))
        theta = jnp.min(cand, axis=1, keepdims=True)                     # (Bn, 1, 1)
        return s_col <= theta                                            # (Bn, L, 1) bool

    s_t_row, s_t_col = col_scores(xt_p)
    s_f_row, s_f_col = col_scores(xf_p)

    mask_t = bottomk_mask(s_t_row, s_t_col)   # generate_mask(score_t, time=False)
    mask_f = bottomk_mask(s_f_row, s_f_col)   # generate_mask(score_f, time=False)

    mask_t1 = jnp.logical_and(mask_t, jnp.logical_not(mask_f))
    mask_f1 = jnp.logical_and(mask_f, jnp.logical_not(mask_t))

    x_t1 = jnp.where(mask_t1, xf, xt)         # per-token swap, broadcast over D
    x_f1 = jnp.where(mask_f1, xt, xf)

    out_t_ref[...] = (0.5 * (x_t1 + xt)).astype(out_t_ref.dtype)
    out_f_ref[...] = (0.5 * (x_f1 + xf)).astype(out_f_ref.dtype)


def _largest_divisor_at_most(n, cap):
    cap = max(1, min(cap, n))
    for d in range(cap, 0, -1):
        if n % d == 0:
            return d
    return 1


def _vmem_limit_bytes():
    """Generation-aware scoped-VMEM budget (raised above the 16/32 MiB defaults)."""
    try:
        kind = jax.devices()[0].device_kind.lower()
    except Exception:
        kind = ""
    if "v2" in kind or "v3" in kind:
        return 12 * 1024 * 1024
    if "v5" in kind or "v6" in kind:          # 128 MiB physical VMEM parts
        return 100 * 1024 * 1024
    return 52 * 1024 * 1024                   # v7x (64 MiB physical) / unknown: safe


def _choose_block_batch(N, L, D, itemsize, vmem_budget):
    """Samples per grid step: fill the MXU M dim (target Bn*L >= 256) while keeping
    >= 2 grid steps (so ("parallel",) can load-balance v7x's two TensorCores) and
    staying inside the VMEM budget."""
    target = max(1, -(-256 // L))             # ceil(256 / L)
    cap = N if N < 2 else max(1, N // 2)
    bn = _largest_divisor_at_most(N, min(target, cap))

    def vmem_estimate(b):
        io = 2 * 2 * 2 * b * L * D * itemsize  # 2 ins + 2 outs, double-buffered
        weights = D * D * 4 + D * 4
        proj = 4 * b * L * D * 4               # projected activations (+ scaled copy)
        att = 4 * b * L * L * 4                # logits / e / att / le
        return io + weights + proj + att

    while bn > 1 and vmem_estimate(bn) > int(0.6 * vmem_budget):
        bn = _largest_divisor_at_most(N, bn - 1)
    return bn


def tokenchange_forward(x_t, x_f, proj_weight, proj_bias, *, ratio,
                        similarity_dtype=None):
    """x_t, x_f: (N, L, D); proj_weight: (D, D); proj_bias: (D,).

    similarity_dtype: dtype of the MXU operands for the projection and the
    xP xP^T similarity matmuls (accumulation stays f32). Defaults to the input
    dtype; pass jnp.bfloat16 for ~2-3x faster matmuls when near-tie ranking
    tolerance allows it.
    """
    N, L, D = x_t.shape
    k = int(ratio * L)
    assert k >= 1, "config.ratio * seq_len must be >= 1 (torch.topk requirement)"
    norm_fact = 1.0 / math.sqrt(D)
    sim_dtype = x_t.dtype if similarity_dtype is None else similarity_dtype

    vmem_budget = _vmem_limit_bytes()
    Bn = _choose_block_batch(N, L, D, x_t.dtype.itemsize, vmem_budget)
    grid = (N // Bn,)

    wt = proj_weight.T                        # so the in-kernel matmul is x @ W^T
    b = proj_bias.reshape(1, D).astype(jnp.float32)

    kernel = functools.partial(_tokenchange_kernel, k=k, norm_fact=norm_fact,
                               sim_dtype=sim_dtype)

    out_t, out_f = pl.pallas_call(
        kernel,
        out_shape=(jax.ShapeDtypeStruct((N, L, D), x_t.dtype),
                   jax.ShapeDtypeStruct((N, L, D), x_f.dtype)),
        grid_spec=pltpu.PrefetchScalarGridSpec(
            num_scalar_prefetch=0,
            grid=grid,
            in_specs=[
                pl.BlockSpec((Bn, L, D), lambda n: (n, 0, 0)),
                pl.BlockSpec((Bn, L, D), lambda n: (n, 0, 0)),
                pl.BlockSpec((D, D), lambda n: (0, 0)),    # resident weight (W^T)
                pl.BlockSpec((1, D), lambda n: (0, 0)),    # resident bias
            ],
            out_specs=[
                pl.BlockSpec((Bn, L, D), lambda n: (n, 0, 0)),
                pl.BlockSpec((Bn, L, D), lambda n: (n, 0, 0)),
            ],
        ),
        compiler_params=pltpu.CompilerParams(
            dimension_semantics=("parallel",),
            vmem_limit_bytes=vmem_budget),
    )(x_t, x_f, wt, b)
    return out_t, out_f


if __name__ == "__main__":
    key = jax.random.PRNGKey(0)
    k1, k2, k3, k4 = jax.random.split(key, 4)

    N, L, D = 8, 8, 128     # batch, seq, d_model (D multiple of 128 -> lane-dense stores)
    RATIO = 0.5             # config.ratio

    x_t = jax.random.normal(k1, (N, L, D), dtype=jnp.float32)
    x_f = jax.random.normal(k2, (N, L, D), dtype=jnp.float32)
    proj_w = jax.random.normal(k3, (D, D), dtype=jnp.float32) * (1.0 / math.sqrt(D))
    proj_b = jax.random.normal(k4, (D,), dtype=jnp.float32) * 0.1

    out_t, out_f = tokenchange_forward(x_t, x_f, proj_w, proj_b, ratio=RATIO)
    jax.block_until_ready((out_t, out_f))

    # Pure-JAX reference of the same math (mirrors the PyTorch forward).
    def reference(x_t, x_f, W, b, ratio):
        n, l, d = x_t.shape
        kk = int(ratio * l)
        nf = 1.0 / math.sqrt(d)
        hi = jax.lax.Precision.HIGHEST
        xt_p = jnp.einsum('nld,kd->nlk', x_t, W, precision=hi) + b
        xf_p = jnp.einsum('nld,kd->nlk', x_f, W, precision=hi) + b
        offdiag = 1.0 - jnp.eye(l, dtype=jnp.float32)

        def col_scores(xp):
            logits = jnp.einsum('nld,nmd->nlm', xp, xp, precision=hi) * nf
            att = jax.nn.softmax(logits, axis=-1) * offdiag
            return jnp.sum(att, axis=1)                     # (n, l)

        s_t = col_scores(xt_p)
        s_f = col_scores(xf_p)

        def bottomk(s):
            theta = jnp.sort(s, axis=-1)[:, kk - 1]         # k-th smallest value
            return s <= theta[:, None]

        m_t = bottomk(s_t)
        m_f = bottomk(s_f)
        m_t1 = m_t & ~m_f
        m_f1 = m_f & ~m_t
        x_t1 = jnp.where(m_t1[:, :, None], x_f, x_t)
        x_f1 = jnp.where(m_f1[:, :, None], x_t, x_f)
        return 0.5 * (x_t1 + x_t), 0.5 * (x_f1 + x_f)

    ref_t, ref_f = reference(x_t, x_f, proj_w, proj_b, RATIO)
    assert out_t.shape == (N, L, D) and out_f.shape == (N, L, D)
    assert jnp.allclose(out_t, ref_t, atol=1e-5, rtol=1e-5)
    assert jnp.allclose(out_f, ref_f, atol=1e-5, rtol=1e-5)

    # Optional fast path: bf16 MXU operands (f32 accumulation). Smoke test only,
    # since near-tie ranking may legitimately differ from the f32 reference.
    out_t_bf, out_f_bf = tokenchange_forward(
        x_t, x_f, proj_w, proj_b, ratio=RATIO, similarity_dtype=jnp.bfloat16)
    jax.block_until_ready((out_t_bf, out_f_bf))
    assert out_t_bf.shape == (N, L, D) and out_f_bf.shape == (N, L, D)
    assert bool(jnp.isfinite(out_t_bf).all()) and bool(jnp.isfinite(out_f_bf).all())

    print("KERNEL_OK")
</pallas_src>

<mosaic_0001>
module attributes {stable_mosaic.version = 11 : i64} {
  func.func @_tokenchange_kernel(%arg0: i32, %arg1: memref<4x8x128xf32, #tpu.memory_space<vmem>>, %arg2: memref<4x8x128xf32, #tpu.memory_space<vmem>>, %arg3: memref<128x128xf32, #tpu.memory_space<vmem>>, %arg4: memref<1x128xf32, #tpu.memory_space<vmem>>, %arg5: memref<4x8x128xf32, #tpu.memory_space<vmem>>, %arg6: memref<4x8x128xf32, #tpu.memory_space<vmem>>) attributes {dimension_semantics = [#tpu.dimension_semantics<parallel>], iteration_bounds = array<i64: 2>, scalar_prefetch = 0 : i64, scratch_operands = 0 : i64, tpu.core_type = #tpu.core_type<tc>, window_params = [{transform_indices = @transform_0, window_bounds = array<i64: 4, 8, 128>}, {transform_indices = @transform_1, window_bounds = array<i64: 4, 8, 128>}, {pipeline_mode = #tpu.pipeline_mode<synchronous>, transform_indices = @transform_2, window_bounds = array<i64: 128, 128>}, {pipeline_mode = #tpu.pipeline_mode<synchronous>, transform_indices = @transform_3, window_bounds = array<i64: 1, 128>}, {transform_indices = @transform_4, window_bounds = array<i64: 4, 8, 128>}, {transform_indices = @transform_5, window_bounds = array<i64: 4, 8, 128>}]} {
    %c0 = arith.constant 0 : index
    %c0_0 = arith.constant 0 : index
    %c0_1 = arith.constant 0 : index
    %0 = vector.load %arg1[%c0, %c0_0, %c0_1] : memref<4x8x128xf32, #tpu.memory_space<vmem>>, vector<4x8x128xf32>
    %c0_2 = arith.constant 0 : index
    %c0_3 = arith.constant 0 : index
    %c0_4 = arith.constant 0 : index
    %1 = vector.load %arg2[%c0_2, %c0_3, %c0_4] : memref<4x8x128xf32, #tpu.memory_space<vmem>>, vector<4x8x128xf32>
    %c0_5 = arith.constant 0 : index
    %c0_6 = arith.constant 0 : index
    %2 = vector.load %arg3[%c0_5, %c0_6] : memref<128x128xf32, #tpu.memory_space<vmem>>, vector<128x128xf32>
    %c0_7 = arith.constant 0 : index
    %c0_8 = arith.constant 0 : index
    %3 = vector.load %arg4[%c0_7, %c0_8] : memref<1x128xf32, #tpu.memory_space<vmem>>, vector<1x128xf32>
    %4 = vector.shape_cast %0 : vector<4x8x128xf32> to vector<32x128xf32>
    %cst = arith.constant dense<0.000000e+00> : vector<32x128xf32>
    %5 = tpu.matmul %4, %2, %cst {dimension_numbers = #tpu.dot_dimension_numbers<[1], [0], [0], [1], [0, 0, 1, 1], [], []>} : vector<32x128xf32>, vector<128x128xf32>, vector<32x128xf32> -> vector<32x128xf32>
    %6 = vector.broadcast %3 : vector<1x128xf32> to vector<32x128xf32>
    %7 = arith.addf %5, %6 : vector<32x128xf32>
    %8 = vector.shape_cast %7 : vector<32x128xf32> to vector<4x8x128xf32>
    %9 = vector.shape_cast %1 : vector<4x8x128xf32> to vector<32x128xf32>
    %cst_9 = arith.constant dense<0.000000e+00> : vector<32x128xf32>
    %10 = tpu.matmul %9, %2, %cst_9 {dimension_numbers = #tpu.dot_dimension_numbers<[1], [0], [0], [1], [0, 0, 1, 1], [], []>} : vector<32x128xf32>, vector<128x128xf32>, vector<32x128xf32> -> vector<32x128xf32>
    %11 = vector.broadcast %3 : vector<1x128xf32> to vector<32x128xf32>
    %12 = arith.addf %10, %11 : vector<32x128xf32>
    %13 = vector.shape_cast %12 : vector<32x128xf32> to vector<4x8x128xf32>
    %14 = tpu.iota {dimensions = array<i32: 0>} : vector<8x8xi32>
    %15 = tpu.iota {dimensions = array<i32: 1>} : vector<8x8xi32>
    %16 = arith.cmpi eq, %14, %15 : vector<8x8xi32>
    %cst_10 = arith.constant 0.0883883461 : f32
    %17 = vector.broadcast %cst_10 : f32 to vector<4x8x128xf32>
    %18 = arith.mulf %8, %17 : vector<4x8x128xf32>
    "tpu.trace_start"() <{level = 10 : i32, message = "bid,bjd->bij"}> : () -> ()
    %cst_11 = arith.constant dense<0.000000e+00> : vector<4x8x8xf32>
    %19 = tpu.matmul %18, %8, %cst_11 {dimension_numbers = #tpu.dot_dimension_numbers<[2], [2], [1], [1], [0, 0, 0, 1, 1, 1], [0], [0]>} : vector<4x8x128xf32>, vector<4x8x128xf32>, vector<4x8x8xf32> -> vector<4x8x8xf32>
    "tpu.trace_stop"() : () -> ()
    %cst_12 = arith.constant dense<0xFF800000> : vector<4x8xf32>
    %20 = vector.multi_reduction <maximumf>, %19, %cst_12 [2] : vector<4x8x8xf32> to vector<4x8xf32>
    %21 = vector.shape_cast %20 : vector<4x8xf32> to vector<4x8x1xf32>
    %22 = vector.broadcast %21 : vector<4x8x1xf32> to vector<4x8x8xf32>
    %23 = arith.subf %19, %22 : vector<4x8x8xf32>
    %24 = math.exp %23 : vector<4x8x8xf32>
    %cst_13 = arith.constant dense<0.000000e+00> : vector<4x8xf32>
    %25 = vector.multi_reduction <add>, %24, %cst_13 [2] : vector<4x8x8xf32> to vector<4x8xf32>
    %26 = vector.shape_cast %25 : vector<4x8xf32> to vector<4x8x1xf32>
    %27 = tpu.reciprocal %26 {approx = true} : vector<4x8x1xf32> -> vector<4x8x1xf32>
    %28 = arith.mulf %26, %27 : vector<4x8x1xf32>
    %cst_14 = arith.constant 2.000000e+00 : f32
    %29 = vector.broadcast %cst_14 : f32 to vector<4x8x1xf32>
    %30 = arith.subf %29, %28 : vector<4x8x1xf32>
    %31 = arith.mulf %27, %30 : vector<4x8x1xf32>
    %32 = vector.broadcast %31 : vector<4x8x1xf32> to vector<4x8x8xf32>
    %33 = arith.mulf %24, %32 : vector<4x8x8xf32>
    %cst_15 = arith.constant 0.000000e+00 : f32
    %34 = vector.shape_cast %16 : vector<8x8xi1> to vector<1x8x8xi1>
    %35 = vector.broadcast %34 : vector<1x8x8xi1> to vector<4x8x8xi1>
    %36 = vector.broadcast %cst_15 : f32 to vector<4x8x8xf32>
    %37 = arith.select %35, %36, %33 : vector<4x8x8xi1>, vector<4x8x8xf32>
    %cst_16 = arith.constant dense<0.000000e+00> : vector<4x8xf32>
    %38 = vector.multi_reduction <add>, %37, %cst_16 [1] : vector<4x8x8xf32> to vector<4x8xf32>
    %39 = vector.shape_cast %38 : vector<4x8xf32> to vector<4x1x8xf32>
    %cst_17 = arith.constant 0.000000e+00 : f32
    %40 = vector.shape_cast %16 : vector<8x8xi1> to vector<1x8x8xi1>
    %41 = vector.broadcast %40 : vector<1x8x8xi1> to vector<4x8x8xi1>
    %42 = vector.shape_cast %39 : vector<4x1x8xf32> to vector<4x1x8xf32>
    %43 = vector.broadcast %42 : vector<4x1x8xf32> to vector<4x8x8xf32>
    %44 = vector.broadcast %cst_17 : f32 to vector<4x8x8xf32>
    %45 = arith.select %41, %43, %44 : vector<4x8x8xi1>, vector<4x8x8xf32>
    %cst_18 = arith.constant dense<0.000000e+00> : vector<4x8xf32>
    %46 = vector.multi_reduction <add>, %45, %cst_18 [2] : vector<4x8x8xf32> to vector<4x8xf32>
    %47 = vector.shape_cast %46 : vector<4x8xf32> to vector<4x8x1xf32>
    %cst_19 = arith.constant 0.0883883461 : f32
    %48 = vector.broadcast %cst_19 : f32 to vector<4x8x128xf32>
    %49 = arith.mulf %13, %48 : vector<4x8x128xf32>
    "tpu.trace_start"() <{level = 10 : i32, message = "bid,bjd->bij"}> : () -> ()
    %cst_20 = arith.constant dense<0.000000e+00> : vector<4x8x8xf32>
    %50 = tpu.matmul %49, %13, %cst_20 {dimension_numbers = #tpu.dot_dimension_numbers<[2], [2], [1], [1], [0, 0, 0, 1, 1, 1], [0], [0]>} : vector<4x8x128xf32>, vector<4x8x128xf32>, vector<4x8x8xf32> -> vector<4x8x8xf32>
    "tpu.trace_stop"() : () -> ()
    %cst_21 = arith.constant dense<0xFF800000> : vector<4x8xf32>
    %51 = vector.multi_reduction <maximumf>, %50, %cst_21 [2] : vector<4x8x8xf32> to vector<4x8xf32>
    %52 = vector.shape_cast %51 : vector<4x8xf32> to vector<4x8x1xf32>
    %53 = vector.broadcast %52 : vector<4x8x1xf32> to vector<4x8x8xf32>
    %54 = arith.subf %50, %53 : vector<4x8x8xf32>
    %55 = math.exp %54 : vector<4x8x8xf32>
    %cst_22 = arith.constant dense<0.000000e+00> : vector<4x8xf32>
    %56 = vector.multi_reduction <add>, %55, %cst_22 [2] : vector<4x8x8xf32> to vector<4x8xf32>
    %57 = vector.shape_cast %56 : vector<4x8xf32> to vector<4x8x1xf32>
    %58 = tpu.reciprocal %57 {approx = true} : vector<4x8x1xf32> -> vector<4x8x1xf32>
    %59 = arith.mulf %57, %58 : vector<4x8x1xf32>
    %cst_23 = arith.constant 2.000000e+00 : f32
    %60 = vector.broadcast %cst_23 : f32 to vector<4x8x1xf32>
    %61 = arith.subf %60, %59 : vector<4x8x1xf32>
    %62 = arith.mulf %58, %61 : vector<4x8x1xf32>
    %63 = vector.broadcast %62 : vector<4x8x1xf32> to vector<4x8x8xf32>
    %64 = arith.mulf %55, %63 : vector<4x8x8xf32>
    %cst_24 = arith.constant 0.000000e+00 : f32
    %65 = vector.shape_cast %16 : vector<8x8xi1> to vector<1x8x8xi1>
    %66 = vector.broadcast %65 : vector<1x8x8xi1> to vector<4x8x8xi1>
    %67 = vector.broadcast %cst_24 : f32 to vector<4x8x8xf32>
    %68 = arith.select %66, %67, %64 : vector<4x8x8xi1>, vector<4x8x8xf32>
    %cst_25 = arith.constant dense<0.000000e+00> : vector<4x8xf32>
    %69 = vector.multi_reduction <add>, %68, %cst_25 [1] : vector<4x8x8xf32> to vector<4x8xf32>
    %70 = vector.shape_cast %69 : vector<4x8xf32> to vector<4x1x8xf32>
    %cst_26 = arith.constant 0.000000e+00 : f32
    %71 = vector.shape_cast %16 : vector<8x8xi1> to vector<1x8x8xi1>
    %72 = vector.broadcast %71 : vector<1x8x8xi1> to vector<4x8x8xi1>
    %73 = vector.shape_cast %70 : vector<4x1x8xf32> to vector<4x1x8xf32>
    %74 = vector.broadcast %73 : vector<4x1x8xf32> to vector<4x8x8xf32>
    %75 = vector.broadcast %cst_26 : f32 to vector<4x8x8xf32>
    %76 = arith.select %72, %74, %75 : vector<4x8x8xi1>, vector<4x8x8xf32>
    %cst_27 = arith.constant dense<0.000000e+00> : vector<4x8xf32>
    %77 = vector.multi_reduction <add>, %76, %cst_27 [2] : vector<4x8x8xf32> to vector<4x8xf32>
    %78 = vector.shape_cast %77 : vector<4x8xf32> to vector<4x8x1xf32>
    %79 = vector.broadcast %39 : vector<4x1x8xf32> to vector<4x8x8xf32>
    %80 = vector.broadcast %47 : vector<4x8x1xf32> to vector<4x8x8xf32>
    %81 = arith.cmpf ole, %79, %80 : vector<4x8x8xf32>
    %82 = arith.extui %81 : vector<4x8x8xi1> to vector<4x8x8xi32>
    %cst_28 = arith.constant dense<0> : vector<4x8xi32>
    %83 = vector.multi_reduction <add>, %82, %cst_28 [2] : vector<4x8x8xi32> to vector<4x8xi32>
    %84 = vector.shape_cast %83 : vector<4x8xi32> to vector<4x8x1xi32>
    %c4_i32 = arith.constant 4 : i32
    %85 = vector.broadcast %c4_i32 : i32 to vector<4x8x1xi32>
    %86 = arith.cmpi sge, %84, %85 : vector<4x8x1xi32>
    %cst_29 = arith.constant 3.000000e+38 : f32
    %87 = vector.broadcast %cst_29 : f32 to vector<4x8x1xf32>
    %88 = arith.select %86, %47, %87 : vector<4x8x1xi1>, vector<4x8x1xf32>
    %cst_30 = arith.constant dense<0x7F800000> : vector<4x1xf32>
    %89 = vector.multi_reduction <minimumf>, %88, %cst_30 [1] : vector<4x8x1xf32> to vector<4x1xf32>
    %90 = vector.shape_cast %89 : vector<4x1xf32> to vector<4x1x1xf32>
    %91 = vector.broadcast %90 : vector<4x1x1xf32> to vector<4x8x1xf32>
    %92 = arith.cmpf ole, %47, %91 : vector<4x8x1xf32>
    %93 = vector.broadcast %70 : vector<4x1x8xf32> to vector<4x8x8xf32>
    %94 = vector.broadcast %78 : vector<4x8x1xf32> to vector<4x8x8xf32>
    %95 = arith.cmpf ole, %93, %94 : vector<4x8x8xf32>
    %96 = arith.extui %95 : vector<4x8x8xi1> to vector<4x8x8xi32>
    %cst_31 = arith.constant dense<0> : vector<4x8xi32>
    %97 = vector.multi_reduction <add>, %96, %cst_31 [2] : vector<4x8x8xi32> to vector<4x8xi32>
    %98 = vector.shape_cast %97 : vector<4x8xi32> to vector<4x8x1xi32>
    %c4_i32_32 = arith.constant 4 : i32
    %99 = vector.broadcast %c4_i32_32 : i32 to vector<4x8x1xi32>
    %100 = arith.cmpi sge, %98, %99 : vector<4x8x1xi32>
    %cst_33 = arith.constant 3.000000e+38 : f32
    %101 = vector.broadcast %cst_33 : f32 to vector<4x8x1xf32>
    %102 = arith.select %100, %78, %101 : vector<4x8x1xi1>, vector<4x8x1xf32>
    %cst_34 = arith.constant dense<0x7F800000> : vector<4x1xf32>
    %103 = vector.multi_reduction <minimumf>, %102, %cst_34 [1] : vector<4x8x1xf32> to vector<4x1xf32>
    %104 = vector.shape_cast %103 : vector<4x1xf32> to vector<4x1x1xf32>
    %105 = vector.broadcast %104 : vector<4x1x1xf32> to vector<4x8x1xf32>
    %106 = arith.cmpf ole, %78, %105 : vector<4x8x1xf32>
    %cst_35 = arith.constant dense<true> : vector<4x8x1xi1>
    %107 = arith.xori %106, %cst_35 : vector<4x8x1xi1>
    %108 = arith.andi %92, %107 : vector<4x8x1xi1>
    %cst_36 = arith.constant dense<true> : vector<4x8x1xi1>
    %109 = arith.xori %92, %cst_36 : vector<4x8x1xi1>
    %110 = arith.andi %106, %109 : vector<4x8x1xi1>
    %111 = vector.shape_cast %108 : vector<4x8x1xi1> to vector<4x8x1xi1>
    %112 = vector.broadcast %111 : vector<4x8x1xi1> to vector<4x8x128xi1>
    %113 = arith.select %112, %1, %0 : vector<4x8x128xi1>, vector<4x8x128xf32>
    %114 = vector.shape_cast %110 : vector<4x8x1xi1> to vector<4x8x1xi1>
    %115 = vector.broadcast %114 : vector<4x8x1xi1> to vector<4x8x128xi1>
    %116 = arith.select %115, %0, %1 : vector<4x8x128xi1>, vector<4x8x128xf32>
    %117 = arith.addf %113, %0 : vector<4x8x128xf32>
    %cst_37 = arith.constant 5.000000e-01 : f32
    %118 = vector.broadcast %cst_37 : f32 to vector<4x8x128xf32>
    %119 = arith.mulf %118, %117 : vector<4x8x128xf32>
    %c0_38 = arith.constant 0 : index
    %c0_39 = arith.constant 0 : index
    %c0_40 = arith.constant 0 : index
    %120 = vector.load %arg5[%c0_38, %c0_39, %c0_40] : memref<4x8x128xf32, #tpu.memory_space<vmem>>, vector<4x8x128xf32>
    tpu.vector_store %arg5[%c0_38, %c0_39, %c0_40], %119 {strides = array<i32>} : memref<4x8x128xf32, #tpu.memory_space<vmem>>, vector<4x8x128xf32>,
    %121 = arith.addf %116, %1 : vector<4x8x128xf32>
    %cst_41 = arith.constant 5.000000e-01 : f32
    %122 = vector.broadcast %cst_41 : f32 to vector<4x8x128xf32>
    %123 = arith.mulf %122, %121 : vector<4x8x128xf32>
    %c0_42 = arith.constant 0 : index
    %c0_43 = arith.constant 0 : index
    %c0_44 = arith.constant 0 : index
    %124 = vector.load %arg6[%c0_42, %c0_43, %c0_44] : memref<4x8x128xf32, #tpu.memory_space<vmem>>, vector<4x8x128xf32>
    tpu.vector_store %arg6[%c0_42, %c0_43, %c0_44], %123 {strides = array<i32>} : memref<4x8x128xf32, #tpu.memory_space<vmem>>, vector<4x8x128xf32>,
    return
  }
  func.func @transform_0(%arg0: i32) -> (i32, i32, i32) {
    %c0_i32 = arith.constant 0 : i32
    %c0_i32_0 = arith.constant 0 : i32
    %c0_i32_1 = arith.constant 0 : i32
    return %arg0, %c0_i32, %c0_i32_0 : i32, i32, i32
  }
  func.func @transform_1(%arg0: i32) -> (i32, i32, i32) {
    %c0_i32 = arith.constant 0 : i32
    %c0_i32_0 = arith.constant 0 : i32
    %c0_i32_1 = arith.constant 0 : i32
    return %arg0, %c0_i32, %c0_i32_0 : i32, i32, i32
  }
  func.func @transform_2(%arg0: i32) -> (i32, i32) {
    %c0_i32 = arith.constant 0 : i32
    %c0_i32_0 = arith.constant 0 : i32
    %c0_i32_1 = arith.constant 0 : i32
    return %c0_i32, %c0_i32_0 : i32, i32
  }
  func.func @transform_3(%arg0: i32) -> (i32, i32) {
    %c0_i32 = arith.constant 0 : i32
    %c0_i32_0 = arith.constant 0 : i32
    %c0_i32_1 = arith.constant 0 : i32
    return %c0_i32, %c0_i32_0 : i32, i32
  }
  func.func @transform_4(%arg0: i32) -> (i32, i32, i32) {
    %c0_i32 = arith.constant 0 : i32
    %c0_i32_0 = arith.constant 0 : i32
    %c0_i32_1 = arith.constant 0 : i32
    return %arg0, %c0_i32, %c0_i32_0 : i32, i32, i32
  }
  func.func @transform_5(%arg0: i32) -> (i32, i32, i32) {
    %c0_i32 = arith.constant 0 : i32
    %c0_i32_0 = arith.constant 0 : i32
    %c0_i32_1 = arith.constant 0 : i32
    return %arg0, %c0_i32, %c0_i32_0 : i32, i32, i32
  }
}

</mosaic_0001>

<bundles_post_ra>
// kernel: tpu_custom_call.1
= control target key start
LH: loop header
LB: loop body
LE: loop exit
PB: predicated region body
PF: predicated region fallthrough
CT: control target
= control target key end

     0   :  { %s2881_s0 = inlined_call_operand.hbm [shape: f32[8,8,128], index: 0, kind: input, shape index: {}]   ;;  %s2882_s1 = inlined_call_operand.hbm [shape: f32[8,8,128], index: 1, kind: input, shape index: {}]   ;;  %s2883_s2 = inlined_call_operand.hbm [shape: f32[128,128], index: 2, kind: input, shape index: {}]   ;;  %s2884_s3 = inlined_call_operand.vmem [shape: f32[1,128], index: 3, kind: input, shape index: {}]   ;;  %s2885_s4 = inlined_call_operand.hbm [shape: f32[8,8,128], index: 4, kind: output, shape index: {0}]   ;;  %s2886_s5 = inlined_call_operand.hbm [shape: f32[8,8,128], index: 5, kind: output, shape index: {1}]  }
   0x1   :  { %2895 = sst [smem:[#allocation18_spill]] %s2881_s0 }
   0x2   :  { %2896 = sst [smem:[#allocation19_spill]] %s2883_s2 }
   0x3   :  { %11 = vsyncpa [#allocation3], 0 }
   0x4   :  { %13 = vsyncpa [#allocation3 + $0x1], 0 }
   0x5   :  { %14 = vsyncpa [#allocation6], 0 }
   0x6   :  { %16 = vsyncpa [#allocation6 + $0x1], 0 }
   0x7   :  { %17 = vsyncpa [#allocation4], 0 }
   0x8   :  { %19 = vsyncpa [#allocation4 + $0x1], 0 }
   0x9   :  { %20 = vsyncpa [#allocation10], 0 }
   0xa   :  { %22 = vsyncpa [#allocation10 + $0x1], 0  ;;  %s2342_s18 = smov 0   ;;  %s2344_s19 = smov 0  }
   0xb   :  { %s2346_s20 = smov 0   ;;  %s2348_s21 = smov 0  }
   0xc LB: > { %2897 = sst [smem:[#allocation16_spill]] %s2293_s20  ;;  %s2363_s22 = sadd.s32 4294967295, %s2297_s21   ;;  %s2297_s21 = sphi %s2348_s21, %s2927_s21   ;;  %s2293_s20 = sphi %s2346_s20, %s2926_s20   ;;  %s2289_s19 = sphi %s2344_s19, %s2925_s19   ;;  %s2285_s18 = sphi %s2342_s18, %s2924_s18  }
   0xd   : > { %s1725_s23 = sadd.s32 4294967294, %s2297_s21   ;;  %p48_p0 = scmp.ne.s32.totalorder %s2289_s19, %s2285_s18 }
   0xe   : > { %p2887_p1 = scmp.eq.s32.totalorder %s2363_s22, 0  ;;  %p146_p3 = scmp.eq.s32.totalorder %s1725_s23, 1 }
   0xf   : > { %p1726_p5 = scmp.ge.s32.totalorder %s2297_s21, 1  ;;  %p179_p7 = scmp.lt.s32.totalorder %s2297_s21, 3 }
  0x10   : > { %p2372_p4 = por %p2887_p1, %p48_p0  ;;  %p2377_p6 = por %p146_p3, %p48_p0 }
  0x11   : > { %p2382_p8 = pnand %p1726_p5, %p179_p7  ;;  %s2299_s27 = smov [#allocation7]  }
  0x12   : > { %s2898_s24 = scalar_select %p2372_p4, 1, 0 }
  0x13   : > { %s2899_s25 = scalar_select %p2377_p6, 1, 0 }
  0x14   : > { %s2900_s26 = scalar_select %p2382_p8, 1, 0 }
  0x15   : > { %s191_s28 = sshll.u32 %s2299_s27, 4  ;;  %p2002_p9 = pneg %p2382_p8  ;;  %s2386_s28 = int_to_ptr.vmem [resolvable:$true] %s191_s28 }
  0x16   : > { %s2398_s30 = sadd.s32 1, %s2297_s21   ;;  %s35_s6 = sadd.s32 1, %s2293_s20 }
  0x17   : > { %p2393_p11 = pnand %p2002_p9, %p2887_p1  ;;  %s32_s7 = ssub.s32 %s2297_s21, %s2398_s30 }
  0x18   : > { %s2902_s2 = sld [smem:[#allocation19_spill]] }
  0x19   : > { %p2105_p13 = pneg %p2393_p11 }
  0x1e   : > { %s2103_s10 = scalar_lea.hbm %s2902_s2, 2048 }
  0x1f   : > { %p2104_p12 = scmp.ne.s32.totalorder %s2902_s2, %s2103_s10  ;;  %p2110_p5 = scmp.lt.u32.totalorder %s2103_s10, %s2902_s2 }
  0x21   : > { %p2106_p0 = pnand %p2105_p13, %p2104_p12 }
  0x23   : > { %p2107_p3 = pneg %p2106_p0 }
  0x25   : > { %p2112_p7 = pnand %p2110_p5, %p2107_p3 }
  0x27   : > { %2115 = shalt.err (!%p2112_p7)
}
  0x28   : > { %s2116_s15 = scalar_lea.vmem %s2386_s28, 2048  ;;  %p2124_p2 = scmp.lt.s32.totalorder %s2386_s28, %s2386_s28 }
  0x29   : > { %p2117_p9 = scmp.ne.s32.totalorder %s2386_s28, %s2116_s15  ;;  %p2125_p6 = scmp.lt.s32.totalorder %s2116_s15, %s2116_s15 }
  0x2b   : > { %p2119_p10 = pnand %p2117_p9, %p2105_p13  ;;  %p2126_p4 = por %p2125_p6, %p2124_p2 }
  0x2d   : > { %p2120_p1 = pneg %p2119_p10 }
  0x2f   : > { %p2127_p8 = pnand %p2126_p4, %p2120_p1 }
  0x31   : > { %2130 = shalt.err (!%p2127_p8)
}
  0x32   : > { %s2890_s16 = smov 128   ;;  %s2892_s17 = smov 8  }
  0x33   : > { %2005 = dma.hbm_to_vmem [thread:$0]  (!%p2393_p11), %s2902_s2, 2048, %s2386_s28, [#allocation6], %s2890_s16, %s2890_s16, %s2892_s17  }
  0x34   : > { %p33_p1 = scmp.eq.s32.totalorder %s32_s7, 0  ;;  %p42_p2 = scmp.ne.s32.totalorder %s2293_s20, %s2289_s19 }
  0x35   : > { %p43_p4 = scmp.eq.s32.totalorder %s2297_s21, 0  ;;  %p2021_p6 = scmp.lt.s32.totalorder %s2297_s21, 2 }
  0x36   : > { %s2432_s8 = scalar_select %p33_p1, %s2293_s20, %s35_s6  }
  0x37   : > { %p44_p8 = por %p43_p4, %p42_p2  ;;  %p2904_p10 = scmp.eq.s32.totalorder %s2363_s22, 1 }
  0x38   : > { %2903 = sst [smem:[#allocation17_spill]] %s2432_s8  ;;  %s208_s29 = sand.u32 1, %s2293_s20  }
  0x39   : > { %p2436_p12 = por %p2904_p10, %p42_p2  ;;  %s1750_s10 = sshll.u32 %s2297_s21, 9 }
  0x3a   : > { %s2442_s11 = sshll.u32 %s208_s29, 5  ;;  %s2906_s0 = sld [smem:[#allocation18_spill]] }
  0x3b   : > { %s212_s6 = scalar_lea.vmem [#allocation2], %s2442_s11  ;;  %p2450_p11 = pnand %p2021_p6, %p44_p8 }
  0x3c   : > { %s219_s7 = sshll.u32 %s212_s6, 4  ;;  %s2459_s27 = scalar_lea.hbm %s2882_s1, %s1750_s10  ;;  %s2454_s7 = int_to_ptr.vmem [resolvable:$true] %s219_s7 }
  0x3d   : > { %s2461_s12 = scalar_lea.sflag [#allocation3], %s208_s29  ;;  %p2133_p0 = pneg %p2450_p11 }
  0x40   : > { %s2447_s28 = scalar_lea.hbm %s2906_s0, %s1750_s10  ;;  %s2136_s17 = scalar_lea.hbm %s2906_s0, 1024 }
  0x41   : > { %s2131_s13 = scalar_lea.hbm %s2447_s28, 512  ;;  %p2137_p7 = scmp.lt.u32.totalorder %s2447_s28, %s2906_s0 }
  0x42   : > { %p2132_p13 = scmp.ne.s32.totalorder %s2447_s28, %s2131_s13  ;;  %p2138_p9 = scmp.lt.u32.totalorder %s2136_s17, %s2131_s13 }
  0x43   : > { %p2140_p2 = scmp.lt.u32.totalorder %s2131_s13, %s2447_s28 }
  0x44   : > { %p2134_p3 = pnand %p2133_p0, %p2132_p13  ;;  %p2139_p1 = por %p2138_p9, %p2137_p7 }
  0x46   : > { %p2135_p5 = pneg %p2134_p3  ;;  %p2141_p4 = por %p2140_p2, %p2139_p1 }
  0x48   : > { %p2142_p6 = pnand %p2141_p4, %p2135_p5 }
  0x4a   : > { %2145 = shalt.err (!%p2142_p6)
}
  0x4b   : > { %s2146_s29 = scalar_lea.vmem %s2454_s7, 512  ;;  %s2302_s16 = smov [#allocation2]  }
  0x4c   : > { %p2147_p8 = scmp.ne.s32.totalorder %s2454_s7, %s2146_s29  ;;  %s2151_s10 = sshll.u32 %s2302_s16, 4  ;;  %s2152_s10 = int_to_ptr.vmem [resolvable:$false] %s2151_s10 }
  0x4d   : > { %s2153_s2 = scalar_lea.vmem %s2152_s10, 1024  ;;  %p2154_p3 = scmp.lt.s32.totalorder %s2454_s7, %s2152_s10 }
  0x4e   : > { %p2149_p10 = pnand %p2147_p8, %p2133_p0  ;;  %p2155_p7 = scmp.lt.s32.totalorder %s2153_s2, %s2146_s29 }
  0x50   : > { %p2150_p13 = pneg %p2149_p10  ;;  %p2156_p9 = por %p2155_p7, %p2154_p3 }
  0x52   : > { %p2157_p1 = pnand %p2156_p9, %p2150_p13 }
  0x54   : > { %2160 = shalt.err (!%p2157_p1)
}
  0x55   : > { %s2908_s17 = smov 8   ;;  %s2909_s8 = smov 128  }
  0x56   : > { %2009 = dma.hbm_to_vmem [thread:$0]  (!%p2450_p11), %s2447_s28, 512, %s2454_s7, %s2461_s12, %s2909_s8, %s2909_s8, %s2908_s17  }
  0x57   : > { %s233_s15 = scalar_lea.vmem [#allocation5], %s2442_s11  ;;  %s229_s13 = sand.u32 1, %s2297_s21  }
  0x58   : > { %s240_s23 = sshll.u32 %s233_s15, 4  ;;  %s2496_s6 = scalar_lea.sflag [#allocation6], %s229_s13  ;;  %s2494_s23 = int_to_ptr.vmem [resolvable:$true] %s240_s23 }
  0x59   : > { %s2161_s29 = scalar_lea.hbm %s2459_s27, 512  ;;  %s2166_s2 = scalar_lea.hbm %s2882_s1, 1024 }
  0x5a   : > { %p2162_p5 = scmp.ne.s32.totalorder %s2459_s27, %s2161_s29  ;;  %p2167_p6 = scmp.lt.u32.totalorder %s2459_s27, %s2882_s1 }
  0x5b   : > { %p2168_p8 = scmp.lt.u32.totalorder %s2166_s2, %s2161_s29  ;;  %p2170_p13 = scmp.lt.u32.totalorder %s2161_s29, %s2459_s27 }
  0x5c   : > { %p2164_p2 = pnand %p2162_p5, %p2133_p0 }
  0x5d   : > { %p2169_p10 = por %p2168_p8, %p2167_p6 }
  0x5e   : > { %p2165_p4 = pneg %p2164_p2 }
  0x5f   : > { %p2171_p3 = por %p2170_p13, %p2169_p10 }
  0x61   : > { %p2172_p7 = pnand %p2171_p3, %p2165_p4 }
  0x63   : > { %2175 = shalt.err (!%p2172_p7)
}
  0x64   : > { %s2176_s11 = scalar_lea.vmem %s2494_s23, 512  ;;  %s2303_s28 = smov [#allocation5]  }
  0x65   : > { %p2177_p9 = scmp.ne.s32.totalorder %s2494_s23, %s2176_s11  ;;  %s2181_s7 = sshll.u32 %s2303_s28, 4  ;;  %s2182_s7 = int_to_ptr.vmem [resolvable:$false] %s2181_s7 }
  0x66   : > { %s2183_s0 = scalar_lea.vmem %s2182_s7, 1024  ;;  %p2184_p2 = scmp.lt.s32.totalorder %s2494_s23, %s2182_s7 }
  0x67   : > { %p2179_p1 = pnand %p2177_p9, %p2133_p0  ;;  %p2185_p6 = scmp.lt.s32.totalorder %s2183_s0, %s2176_s11 }
  0x69   : > { %p2180_p5 = pneg %p2179_p1  ;;  %p2186_p8 = por %p2185_p6, %p2184_p2 }
  0x6b   : > { %p2187_p10 = pnand %p2186_p8, %p2180_p5 }
  0x6d   : > { %2190 = shalt.err (!%p2187_p10)
}
  0x6e   : > { %2012 = dma.hbm_to_vmem [thread:$0]  (!%p2450_p11), %s2459_s27, 512, %s2494_s23, %s2496_s6, %s2909_s8, %s2909_s8, %s2908_s17  }
  0x6f   : > { %p2910_p0 = scmp.ne.s32.totalorder %s2900_s26, 0 }
  0x70   : > { %s2528_s20 = sand.u32 (!%p2910_p0), 1, %s2289_s19   ;;  %p2911_p4 = scmp.ne.s32.totalorder (!%p2910_p0), %s2898_s24, 0 }
  0x71   : > { %252 = sbr.rel (%p2910_p0) target bundleno = 1316 (0x524), region = 36  ;;  %s2531_s12 = sshll.u32 (!%p2910_p0), %s2528_s20, 5 }
  0x72   : > { %s255_s14 = scalar_lea.sflag (!%p2910_p0), [#allocation3], %s2528_s20  ;;  %s2535_s15 = scalar_lea.vmem (!%p2910_p0), [#allocation2], %s2531_s12 }
  0x78   : > { %2264 = dma.done.wait (%p2911_p4), %s255_s14, 512  }
  0x79   : > { %2266 = vsyncadd (%p2911_p4), %s255_s14, 4294966784  ;;  %s263_s26 = sand.u32 1, %s2363_s22   ;;  %s2543_s17 = scalar_lea.vmem [#allocation5], %s2531_s12 }
  0x7a   : > { %s264_s27 = scalar_lea.sflag [#allocation6], %s263_s26 }
  0x7b   : > { %2268 = dma.done.wait (%p2911_p4), %s264_s27, 512  }
  0x7c   : > { %2270 = vsyncadd (%p2911_p4), %s264_s27, 4294966784  ;;  %p2912_p11 = scmp.eq.s32.totalorder %s2363_s22, 0 }
  0x7e   : > { %2272 = dma.done.wait (%p2912_p11), [#allocation6], 2048   ;;  %p2913_p13 = pmov %p2912_p11 }
  0x7f   : > { %v320_v0 = vld [vmem:[#allocation7] sm:$0xff]  ;;  %v321_v1 = vld [vmem:[#allocation7 + $0x8] sm:$0xff]  ;;  %v322_v2 = vld [vmem:[#allocation7 + $0x10] sm:$0xff]  ;;  %v2304_v32 = vmov 0.0   ;;  %vm2305_vm0 = vmmov 0   ;;  %vm802_vm1 = vcmask 64512  }
  0x80   : > { %2274 = vsyncadd (%p2913_p13), [#allocation6], 4294965248  ;;  %v1926_v3 = vpack.c.bf16 %v321_v1, %v320_v0  ;;  %v323_v4 = vld [vmem:[#allocation7 + $0x18] sm:$0xff]  ;;  %v324_v6 = vld [vmem:[#allocation7 + $0x20] sm:$0xff]  ;;  %s2757_s23 = scalar_lea.vmem [#allocation8], %s2531_s12  ;;  %s2766_s13 = scalar_lea.vmem [#allocation9], %s2531_s12 }
  0x81   : > { %v1930_v5 = vpack.c.bf16 %v323_v4, %v322_v2  ;;  %v325_v7 = vld [vmem:[#allocation7 + $0x28] sm:$0xff]  ;;  %v312_v9 = vld [vmem:[%s2535_s15] sm:$0xff]  ;;  %v326_v10 = vld [vmem:[#allocation7 + $0x30] sm:$0xff]  ;;  %s1752_s6 = sshll.u32 %s2363_s22, 9  ;;  %s1572_s29 = sshll.u32 %s2757_s23, 4  ;;  %s2798_s29 = int_to_ptr.vmem [resolvable:$true] %s1572_s29 }
  0x82   : > { %1927 = vmatprep.subr.bf16.mxu0 %v1926_v3  ;;  %1959 = vmatprep.subr.bf16.mxu1 %v1926_v3  ;;  %v1934_v8 = vpack.c.bf16 %v325_v7, %v324_v6  ;;  %v327_v11 = vld [vmem:[#allocation7 + $0x38] sm:$0xff]  ;;  %v316_v12 = vld [vmem:[%s2543_s17] sm:$0xff]  ;;  %v329_v15 = vld [vmem:[#allocation7 + $0x48] sm:$0xff]  ;;  %s2795_s22 = scalar_lea.hbm %s2885_s4, %s1752_s6  ;;  %s1588_s2 = sshll.u32 %s2766_s13, 4  ;;  %s2805_s2 = int_to_ptr.vmem [resolvable:$true] %s1588_s2 }
  0x83   : > { %1929 = vmatpush3.bf16.msra.mxu0 %v1926_v3  ;;  %1961 = vmatpush3.bf16.msra.mxu1 %v1926_v3  ;;  %v1938_v13 = vpack.c.bf16 %v327_v11, %v326_v10  ;;  %v328_v14 = vld [vmem:[#allocation7 + $0x40] sm:$0xff]  ;;  %v330_v17 = vld [vmem:[#allocation7 + $0x50] sm:$0xff]  ;;  %v331_v18 = vld [vmem:[#allocation7 + $0x58] sm:$0xff]  ;;  %s2803_s7 = scalar_lea.hbm %s2886_s5, %s1752_s6  ;;  %s1554_s0 = scalar_lea.sflag [#allocation4], %s2528_s20 }
  0x84   : > { %1931 = vmatprep.subr.bf16.mxu0 %v1930_v5  ;;  %1963 = vmatprep.subr.bf16.mxu1 %v1930_v5  ;;  %v1942_v16 = vpack.c.bf16 %v329_v15, %v328_v14  ;;  %v1946_v19 = vpack.c.bf16 %v331_v18, %v330_v17  ;;  %v332_v20 = vld [vmem:[#allocation7 + $0x60] sm:$0xff]  ;;  %v333_v21 = vld [vmem:[#allocation7 + $0x68] sm:$0xff]  ;;  %v334_v23 = vld [vmem:[#allocation7 + $0x70] sm:$0xff]  ;;  %s2191_s12 = scalar_lea.vmem %s2798_s29, 512  ;;  %s2308_s14 = smov [#allocation8]  }
  0x85   : > { %1842 = vmatprep.mubr.f32.mxu0 %v312_v9  ;;  %1880 = vmatprep.mubr.f32.mxu1 %v316_v12  ;;  %v1950_v22 = vpack.c.bf16 %v333_v21, %v332_v20  ;;  %v335_v24 = vld [vmem:[#allocation7 + $0x78] sm:$0xff]  ;;  %v2556_v26 = vld [vmem:[%s2535_s15 + $0x8] sm:$0xff]  ;;  %v314_v28 = vld [vmem:[%s2535_s15 + $0x10] sm:$0xff]  ;;  %p2192_p3 = scmp.ne.s32.totalorder %s2798_s29, %s2191_s12 }
  0x86   : > { %v1954_v25 = vpack.c.bf16 %v335_v24, %v334_v23  ;;  %v2559_v27 = vld [vmem:[%s2543_s17 + $0x8] sm:$0xff]  ;;  %v318_v29 = vld [vmem:[%s2543_s17 + $0x10] sm:$0xff]  ;;  %v315_v30 = vld [vmem:[%s2535_s15 + $0x18] sm:$0xff] }
  0x87   : > { %1933 = vmatpush3.bf16.msra.mxu0 %v1930_v5  ;;  %1965 = vmatpush3.bf16.msra.mxu1 %v1930_v5  ;;  %v319_v31 = vld [vmem:[%s2543_s17 + $0x18] sm:$0xff]  ;;  %v1741_v33 = vld [vmem:[%s2884_s3] ss:$0 sm:$0xff]  ;;  %p2193_p7 = pnand %p2192_p3, %p2436_p12 }
  0x88   : > { %1935 = vmatprep.subr.bf16.mxu0 %v1934_v8  ;;  %1967 = vmatprep.subr.bf16.mxu1 %v1934_v8 }
  0x89   : > { %p2194_p9 = pneg %p2193_p7 }
  0x8b   : > { %1937 = vmatpush3.bf16.msra.mxu0 %v1934_v8  ;;  %1969 = vmatpush3.bf16.msra.mxu1 %v1934_v8 }
  0x8c   : > { %1939 = vmatprep.subr.bf16.mxu0 %v1938_v13  ;;  %1971 = vmatprep.subr.bf16.mxu1 %v1938_v13 }
  0x8f   : > { %1941 = vmatpush3.bf16.msra.mxu0 %v1938_v13  ;;  %1973 = vmatpush3.bf16.msra.mxu1 %v1938_v13 }
  0x90   : > { %1943 = vmatprep.subr.bf16.mxu0 %v1942_v16  ;;  %1975 = vmatprep.subr.bf16.mxu1 %v1942_v16 }
  0x93   : > { %1945 = vmatpush3.bf16.msra.mxu0 %v1942_v16  ;;  %1977 = vmatpush3.bf16.msra.mxu1 %v1942_v16 }
  0x94   : > { %1947 = vmatprep.subr.bf16.mxu0 %v1946_v19  ;;  %1979 = vmatprep.subr.bf16.mxu1 %v1946_v19 }
  0x97   : > { %1949 = vmatpush3.bf16.msra.mxu0 %v1946_v19  ;;  %1981 = vmatpush3.bf16.msra.mxu1 %v1946_v19 }
  0x98   : > { %1951 = vmatprep.subr.bf16.mxu0 %v1950_v22  ;;  %1983 = vmatprep.subr.bf16.mxu1 %v1950_v22 }
  0x9b   : > { %1953 = vmatpush3.bf16.msra.mxu0 %v1950_v22  ;;  %1985 = vmatpush3.bf16.msra.mxu1 %v1950_v22 }
  0x9c   : > { %1955 = vmatprep.subr.bf16.mxu0 %v1954_v25  ;;  %1987 = vmatprep.subr.bf16.mxu1 %v1954_v25 }
  0x9f   : > { %1957 = vmatpush3.bf16.msra.mxu0 %v1954_v25  ;;  %1989 = vmatpush3.bf16.msra.mxu1 %v1954_v25 }
  0xa0   : > { %1891 = vmatprep.subr.mxu1 %v2304_v32  ;;  %1886 = vmatprep.subr.mxu0 %v2304_v32 }
  0xa2   : > { %1843 = vmatmul.mubr.f32.vlgmr.msra.gmra.mrb[0].mxu0 %v2556_v26  ;;  %1881 = vmatmul.mubr.f32.vlgmr.msra.gmra.mrb[0].mxu1 %v2559_v27 }
  0xa3   : > { %1845 = vmatprep.mubr.f32.mxu0 %v314_v28  ;;  %1883 = vmatprep.mubr.f32.mxu1 %v318_v29 }
  0xa6   : > { %1846 = vmatmul.mubr.f32.gmra.mrb[2].mxu0 %v315_v30  ;;  %1884 = vmatmul.mubr.f32.gmra.mrb[2].mxu1 %v319_v31 }
  0xa7   : > { %1893 = vmatprep.mubr.msk.f32.mxu1 %vm2305_vm0, %v2304_v32  ;;  %1888 = vmatprep.mubr.msk.f32.mxu0 %vm2305_vm0, %v2304_v32 }
 0x175   : > { %v1844_v34 = vpop.f32.mrb[0].mxu0  ;;  %v1882_v35 = vpop.f32.mrb[0].mxu1 }
 0x176   : > { %v415_v36 = vadd.f32 %v1844_v34, %v1741_v33  ;;  %v409_v37 = vpop.f32.mrb[1].mxu0  ;;  %v494_v38 = vpop.f32.mrb[1].mxu1  ;;  %v500_v48 = vadd.f32 %v1882_v35, %v1741_v33 }
 0x177   : > { %v410_v39 = vadd.f32 %v1741_v33, %v409_v37  ;;  %v495_v50 = vadd.f32 %v1741_v33, %v494_v38 }
 0x178   : > { %v519_v40 = vmul.f32 0.088388346, %v415_v36  ;;  %1892 = vmatpush3.xpose.msra.mxu1 %v415_v36  ;;  %v910_v52 = vmul.f32 0.088388346, %v500_v48 }
 0x179   : > { %v518_v41 = vmul.f32 0.088388346, %v410_v39  ;;  %v1847_v42 = vpop.f32.mrb[2].mxu0  ;;  %1887 = vmatpush3.xpose.msra.mxu0 %v410_v39  ;;  %1901 = vmatprep.subr.mxu1 %v2304_v32  ;;  %v1885_v43 = vpop.f32.mrb[2].mxu1  ;;  %v909_v54 = vmul.f32 0.088388346, %v495_v50 }
 0x17a   : > { %v425_v44 = vadd.f32 %v1847_v42, %v1741_v33  ;;  %v419_v45 = vpop.f32.mrb[3].mxu0  ;;  %1896 = vmatprep.subr.mxu0 %v2304_v32  ;;  %v504_v46 = vpop.f32.mrb[3].mxu1  ;;  %v510_v53 = vadd.f32 %v1885_v43, %v1741_v33 }
 0x17b   : > { %v420_v47 = vadd.f32 %v1741_v33, %v419_v45  ;;  %1894 = vmatmul.mubr.f32.vlgmr.msra.gmra.mrb[4].mxu1 %v519_v40  ;;  %v505_v55 = vadd.f32 %v1741_v33, %v504_v46 }
 0x17c   : > { %v521_v49 = vmul.f32 0.088388346, %v425_v44  ;;  %1889 = vmatmul.mubr.f32.vlgmr.msra.gmra.mrb[4].mxu0 %v518_v41  ;;  %1902 = vmatpush3.xpose.msra.mxu1 %v425_v44  ;;  %v912_v56 = vmul.f32 0.088388346, %v510_v53 }
 0x17d   : > { %v520_v51 = vmul.f32 0.088388346, %v420_v47  ;;  %1897 = vmatpush3.xpose.msra.mxu0 %v420_v47  ;;  %1903 = vmatprep.mubr.msk.f32.mxu1 %vm2305_vm0, %v2304_v32  ;;  %v911_v57 = vmul.f32 0.088388346, %v505_v55 }
 0x17e   : > { %1898 = vmatprep.mubr.msk.f32.mxu0 %vm2305_vm0, %v2304_v32  ;;  %1906 = vmatprep.subr.mxu0 %v2304_v32 }
 0x17f   : > { %1904 = vmatmul.mubr.f32.vlgmr.msra.gmra.mrb[6].mxu1 %v521_v49  ;;  %1911 = vmatprep.subr.mxu1 %v2304_v32 }
 0x180   : > { %1899 = vmatmul.mubr.f32.vlgmr.msra.gmra.mrb[6].mxu0 %v520_v51  ;;  %1912 = vmatpush3.xpose.msra.mxu1 %v500_v48 }
 0x181   : > { %1907 = vmatpush3.xpose.msra.mxu0 %v495_v50  ;;  %1908 = vmatprep.mubr.msk.f32.mxu0 %vm2305_vm0, %v2304_v32 }
 0x182   : > { %1916 = vmatprep.subr.mxu0 %v2304_v32  ;;  %1913 = vmatprep.mubr.msk.f32.mxu1 %vm2305_vm0, %v2304_v32 }
 0x183   : > { %1914 = vmatmul.mubr.f32.vlgmr.msra.gmra.mrb[8].mxu1 %v910_v52  ;;  %1921 = vmatprep.subr.mxu1 %v2304_v32 }
 0x184   : > { %1909 = vmatmul.mubr.f32.vlgmr.msra.gmra.mrb[8].mxu0 %v909_v54  ;;  %1922 = vmatpush3.xpose.msra.mxu1 %v510_v53 }
 0x185   : > { %1917 = vmatpush3.xpose.msra.mxu0 %v505_v55  ;;  %1918 = vmatprep.mubr.msk.f32.mxu0 %vm2305_vm0, %v2304_v32 }
 0x186   : > { %1923 = vmatprep.mubr.msk.f32.mxu1 %vm2305_vm0, %v2304_v32 }
 0x187   : > { %1924 = vmatmul.mubr.f32.vlgmr.msra.gmra.mrb[10].mxu1 %v912_v56 }
 0x188   : > { %1919 = vmatmul.mubr.f32.vlgmr.msra.gmra.mrb[10].mxu0 %v911_v57 }
 0x24e   : > { %v658_v58 = vpop.f32.mrb[4].mxu1 }
 0x24f   : > { %v588_v59 = vpop.f32.mrb[4].mxu0  ;;  %v1895_v60 = vpop.f32.mrb[5].mxu1  ;;  %v806_v61 = vsel %vm802_vm1, %v658_v58, -inf }
 0x250   : > { %807 = vmax.xlane.f32.xlu0 %v806_v61  ;;  %v1890_v62 = vpop.f32.mrb[5].mxu0  ;;  %v803_v1 = vsel %vm802_vm1, %v588_v59, -inf }
 0x252   : > { %v798_v63 = vpop.f32.mrb[6].mxu1 }
 0x253   : > { %v812_v0 = vsel %vm802_vm1, %v798_v63, -inf  ;;  %v728_v2 = vpop.f32.mrb[6].mxu0  ;;  %v1905_v3 = vpop.f32.mrb[7].mxu1 }
 0x254   : > { %813 = vmax.xlane.f32.xlu1 %v812_v0  ;;  %804 = vmax.xlane.f32.xlu0 %v803_v1  ;;  %v1900_v4 = vpop.f32.mrb[7].mxu0  ;;  %v809_v5 = vsel %vm802_vm1, %v728_v2, -inf }
 0x256   : > { %v1049_v6 = vpop.f32.mrb[8].mxu1 }
 0x257   : > { %v979_v7 = vpop.f32.mrb[8].mxu0  ;;  %v1915_v8 = vpop.f32.mrb[9].mxu1  ;;  %v1196_v11 = vsel %vm802_vm1, %v1049_v6, -inf }
 0x258   : > { %810 = vmax.xlane.f32.xlu1 %v809_v5  ;;  %v1193_v9 = vsel %vm802_vm1, %v979_v7, -inf  ;;  %v1910_v10 = vpop.f32.mrb[9].mxu0 }
 0x259   : > { %1194 = vmax.xlane.f32.xlu0 %v1193_v9 }
 0x25a   : > { %v1189_v12 = vpop.f32.mrb[10].mxu1 }
 0x25b   : > { %v1119_v13 = vpop.f32.mrb[10].mxu0  ;;  %v1925_v14 = vpop.f32.mrb[11].mxu1  ;;  %v1202_v17 = vsel %vm802_vm1, %v1189_v12, -inf }
 0x25c   : > { %1197 = vmax.xlane.f32.xlu1 %v1196_v11  ;;  %v1199_v15 = vsel %vm802_vm1, %v1119_v13, -inf  ;;  %v1920_v16 = vpop.f32.mrb[11].mxu0 }
 0x25d   : > { %1200 = vmax.xlane.f32.xlu0 %v1199_v15 }
 0x260   : > { %1203 = vmax.xlane.f32.xlu1 %v1202_v17 }
 0x2dd   : > { %v808_v18 = vpop.xlane.xlu0 %807 }
 0x2de   : > { %v816_v19 = vsub.f32 %v658_v58, %v808_v18 }
 0x2e0   : > { %v821_v20 = vmul.f32 1.442695, %v816_v19 }
 0x2e1   : > { %v814_v21 = vpop.xlane.xlu1 %813  ;;  %v805_v22 = vpop.xlane.xlu0 %804 }
 0x2e2   : > { %2065 = vpow2.f32 %v821_v20  ;;  %v818_v23 = vsub.f32 %v798_v63, %v814_v21  ;;  %v815_v24 = vsub.f32 %v588_v59, %v805_v22  ;;  %v513_v63 = vlaneseq }
 0x2e4   : > { %v825_v25 = vmul.f32 1.442695, %v818_v23  ;;  %v819_v28 = vmul.f32 1.442695, %v815_v24  ;;  %v514_v4 = vshrl.u32 %v513_v63, 7  ;;  %v516_v5 = vand.u32 127, %v513_v63 }
 0x2e5   : > { %v811_v29 = vpop.xlane.xlu1 %810 }
 0x2e6   : > { %2067 = vpow2.f32 %v825_v25  ;;  %v817_v30 = vsub.f32 %v728_v2, %v811_v29  ;;  %v1195_v31 = vpop.xlane.xlu0 %1194  ;;  %vm2609_vm2 = vcmp.eq.s32.totalorder %v514_v4, %v516_v5 }
 0x2e7   : > { %2069 = vpow2.f32 %v819_v28  ;;  %v1205_v32 = vsub.f32 %v979_v7, %v1195_v31 }
 0x2e8   : > { %v823_v33 = vmul.f32 1.442695, %v817_v30 }
 0x2e9   : > { %v1209_v34 = vmul.f32 1.442695, %v1205_v32  ;;  %v1198_v35 = vpop.xlane.xlu1 %1197 }
 0x2ea   : > { %2071 = vpow2.f32 %v823_v33  ;;  %v1206_v36 = vsub.f32 %v1049_v6, %v1198_v35  ;;  %v1201_v37 = vpop.xlane.xlu0 %1200 }
 0x2eb   : > { %v1207_v38 = vsub.f32 %v1119_v13, %v1201_v37  ;;  %2073 = vpow2.f32 %v1209_v34 }
 0x2ec   : > { %v2066_v39 = vpop.eup %2065  ;;  %v1211_v40 = vmul.f32 1.442695, %v1206_v36 }
 0x2ed   : > { %v1213_v41 = vmul.f32 1.442695, %v1207_v38  ;;  %v1204_v42 = vpop.xlane.xlu1 %1203  ;;  %v830_v43 = vsel %vm802_vm1, %v2066_v39, 0.0 }
 0x2ee   : > { %2075 = vpow2.f32 %v1211_v40  ;;  %v1208_v44 = vsub.f32 %v1189_v12, %v1204_v42  ;;  %831 = vadd.xlane.f32.xlu1 %v830_v43 }
 0x2ef   : > { %2077 = vpow2.f32 %v1213_v41 }
 0x2f0   : > { %v2068_v45 = vpop.eup %2067  ;;  %v1215_v46 = vmul.f32 1.442695, %v1208_v44 }
 0x2f1   : > { %v2070_v47 = vpop.eup %2069  ;;  %v836_v48 = vsel %vm802_vm1, %v2068_v45, 0.0 }
 0x2f2   : > { %2079 = vpow2.f32 %v1215_v46  ;;  %837 = vadd.xlane.f32.xlu1 %v836_v48  ;;  %v827_v49 = vsel %vm802_vm1, %v2070_v47, 0.0 }
 0x2f3   : > { %828 = vadd.xlane.f32.xlu0 %v827_v49 }
 0x2f4   : > { %v2589_v50 = vpop.eup %2071 }
 0x2f5   : > { %v833_v51 = vsel %vm802_vm1, %v2589_v50, 0.0  ;;  %v2593_v52 = vpop.eup %2073 }
 0x2f6   : > { %v1217_v55 = vsel %vm802_vm1, %v2593_v52, 0.0 }
 0x2f7   : > { %834 = vadd.xlane.f32.xlu0 %v833_v51 }
 0x2f8   : > { %v2595_v53 = vpop.eup %2075 }
 0x2f9   : > { %v1220_v54 = vsel %vm802_vm1, %v2595_v53, 0.0  ;;  %v2601_v56 = vpop.eup %2077 }
 0x2fa   : > { %1221 = vadd.xlane.f32.xlu1 %v1220_v54  ;;  %v1223_v59 = vsel %vm802_vm1, %v2601_v56, 0.0 }
 0x2fb   : > { %1218 = vadd.xlane.f32.xlu0 %v1217_v55 }
 0x2fc   : > { %v2603_v57 = vpop.eup %2079 }
 0x2fd   : > { %v1226_v58 = vsel %vm802_vm1, %v2603_v57, 0.0 }
 0x2fe   : > { %1227 = vadd.xlane.f32.xlu1 %v1226_v58 }
 0x2ff   : > { %1224 = vadd.xlane.f32.xlu0 %v1223_v59 }
 0x37b   : > { %v832_v60 = vpop.xlane.xlu1 %831 }
 0x37c   : > { %2081 = vrcp.f32 %v832_v60 }
 0x37f   : > { %v838_v61 = vpop.xlane.xlu1 %837 }
 0x380   : > { %2083 = vrcp.f32 %v838_v61  ;;  %v829_v62 = vpop.xlane.xlu0 %828 }
 0x381   : > { %2085 = vrcp.f32 %v829_v62 }
 0x384   : > { %v835_v0 = vpop.xlane.xlu0 %834 }
 0x385   : > { %2087 = vrcp.f32 %v835_v0 }
 0x386   : > { %v2082_v1 = vpop.eup %2081 }
 0x387   : > { %v844_v2 = vmul.f32 %v2082_v1, %v832_v60  ;;  %v1222_v3 = vpop.xlane.xlu1 %1221 }
 0x388   : > { %2089 = vrcp.f32 %v1222_v3  ;;  %v1219_v6 = vpop.xlane.xlu0 %1218 }
 0x389   : > { %v848_v7 = vsub.f32 2.0, %v844_v2  ;;  %2091 = vrcp.f32 %v1219_v6 }
 0x38a   : > { %v2084_v8 = vpop.eup %2083 }
 0x38b   : > { %v2086_v9 = vpop.eup %2085  ;;  %v852_v10 = vmul.f32 %v2082_v1, %v848_v7  ;;  %v846_v11 = vmul.f32 %v2084_v8, %v838_v61  ;;  %v1228_v12 = vpop.xlane.xlu1 %1227 }
 0x38c   : > { %v843_v14 = vmul.f32 %v2086_v9, %v829_v62  ;;  %2093 = vrcp.f32 %v1228_v12  ;;  %v1225_v15 = vpop.xlane.xlu0 %1224 }
 0x38d   : > { %v856_v16 = vmul.f32 %v2066_v39, %v852_v10  ;;  %v850_v17 = vsub.f32 2.0, %v846_v11  ;;  %2095 = vrcp.f32 %v1225_v15 }
 0x38e   : > { %v847_v18 = vsub.f32 2.0, %v843_v14 }
 0x38f   : > { %v2088_v19 = vpop.eup %2087  ;;  %v862_v20 = vsel %vm2609_vm2, 0.0, %v856_v16  ;;  %v854_v21 = vmul.f32 %v2084_v8, %v850_v17 }
 0x390   : > { %v851_v22 = vmul.f32 %v2086_v9, %v847_v18  ;;  %v845_v23 = vmul.f32 %v2088_v19, %v835_v0  ;;  %v872_v24 = vsel %vm802_vm1, %v862_v20, 0.0 }
 0x391   : > { %v858_v25 = vmul.f32 %v2068_v45, %v854_v21  ;;  %v873_v28 = vrot.slane %v872_v24, 4 }
 0x392   : > { %v2090_v29 = vpop.eup %2089  ;;  %v855_v30 = vmul.f32 %v2070_v47, %v851_v22  ;;  %v849_v31 = vsub.f32 2.0, %v845_v23 }
 0x393   : > { %v2092_v32 = vpop.eup %2091  ;;  %v864_v33 = vsel %vm2609_vm2, 0.0, %v858_v25  ;;  %v1234_v34 = vmul.f32 %v2090_v29, %v1222_v3  ;;  %v874_v35 = vadd.f32 %v873_v28, %v872_v24 }
 0x394   : > { %v861_v36 = vsel %vm2609_vm2, 0.0, %v855_v30  ;;  %v853_v37 = vmul.f32 %v2088_v19, %v849_v31  ;;  %v1233_v38 = vmul.f32 %v2092_v32, %v1219_v6  ;;  %v886_v39 = vsel %vm802_vm1, %v864_v33, 0.0 }
 0x395   : > { %v1238_v40 = vsub.f32 2.0, %v1234_v34  ;;  %v875_v41 = vrot.slane %v874_v35, 2  ;;  %v887_v42 = vrot.slane %v886_v39, 4  ;;  %v865_v43 = vsel %vm802_vm1, %v861_v36, 0.0 }
 0x396   : > { %v2094_v44 = vpop.eup %2093  ;;  %v857_v45 = vmul.f32 %v2589_v50, %v853_v37  ;;  %v1237_v46 = vsub.f32 2.0, %v1233_v38  ;;  %v866_v47 = vrot.slane %v865_v43, 4 }
 0x397   : > { %v2096_v48 = vpop.eup %2095  ;;  %v1242_v49 = vmul.f32 %v2090_v29, %v1238_v40  ;;  %v1236_v51 = vmul.f32 %v2094_v44, %v1228_v12  ;;  %v876_v54 = vadd.f32 %v875_v41, %v874_v35  ;;  %v888_v55 = vadd.f32 %v887_v42, %v886_v39 }
 0x398   : > { %v863_v58 = vsel %vm2609_vm2, 0.0, %v857_v45  ;;  %v1241_v59 = vmul.f32 %v2092_v32, %v1237_v46  ;;  %v1235_v60 = vmul.f32 %v2096_v48, %v1225_v15  ;;  %v867_v61 = vadd.f32 %v866_v47, %v865_v43 }
 0x399   : > { %v1246_v62 = vmul.f32 %v2595_v53, %v1242_v49  ;;  %v1240_v63 = vsub.f32 2.0, %v1236_v51  ;;  %v877_v0 = vrot.slane %v876_v54, 1  ;;  %v889_v1 = vrot.slane %v888_v55, 2 }
 0x39a   : > { %v1245_v50 = vmul.f32 %v2593_v52, %v1241_v59  ;;  %v1239_v2 = vsub.f32 2.0, %v1235_v60  ;;  %v868_v3 = vrot.slane %v867_v61, 2  ;;  %v879_v4 = vsel %vm802_vm1, %v863_v58, 0.0 }
 0x39b   : > { %v1250_v5 = vsel %vm2609_vm2, 0.0, %v1246_v62  ;;  %v1244_v6 = vmul.f32 %v2094_v44, %v1240_v63  ;;  %v2630_v7 = vadd.f32 %v877_v0, %v876_v54  ;;  %v890_v8 = vadd.f32 %v889_v1, %v888_v55 }
 0x39c   : > { %v1249_v9 = vsel %vm2609_vm2, 0.0, %v1245_v50  ;;  %v1243_v53 = vmul.f32 %v2096_v48, %v1239_v2  ;;  %v869_v10 = vadd.f32 %v868_v3, %v867_v61  ;;  %v880_v11 = vrot.slane %v879_v4, 4 }
 0x39d   : > { %v1248_v12 = vmul.f32 %v2603_v57, %v1244_v6  ;;  %v894_v52 = vsel %vm2609_vm2, %v2630_v7, 0.0  ;;  %v891_v14 = vrot.slane %v890_v8, 1  ;;  %v1260_v15 = vsel %vm802_vm1, %v1250_v5, 0.0 }
 0x39e   : > { %v1247_v16 = vmul.f32 %v2601_v56, %v1243_v53  ;;  %v900_v17 = vsel %vm802_vm1, %v894_v52, 0.0  ;;  %v870_v18 = vrot.slane %v869_v10, 1  ;;  %v881_v19 = vadd.f32 %v880_v11, %v879_v4 }
 0x39f   : > { %v1252_v20 = vsel %vm2609_vm2, 0.0, %v1248_v12  ;;  %901 = vadd.xlane.f32.xlu1 %v900_v17  ;;  %v2643_v21 = vadd.f32 %v891_v14, %v890_v8  ;;  %v1261_v57 = vrot.slane %v1260_v15, 4  ;;  %v1253_v22 = vsel %vm802_vm1, %v1249_v9, 0.0 }
 0x3a0   : > { %v1251_v23 = vsel %vm2609_vm2, 0.0, %v1247_v16  ;;  %v2648_v24 = vadd.f32 %v870_v18, %v869_v10  ;;  %v882_v25 = vrot.slane %v881_v19, 2  ;;  %v1254_v56 = vrot.slane %v1253_v22, 4 }
 0x3a1   : > { %v896_v28 = vsel %vm2609_vm2, %v2643_v21, 0.0  ;;  %v1262_v29 = vadd.f32 %v1261_v57, %v1260_v15  ;;  %v1274_v30 = vsel %vm802_vm1, %v1252_v20, 0.0  ;;  %v1267_v31 = vsel %vm802_vm1, %v1251_v23, 0.0 }
 0x3a2   : > { %v906_v32 = vsel %vm802_vm1, %v896_v28, 0.0  ;;  %v893_v33 = vsel %vm2609_vm2, %v2648_v24, 0.0  ;;  %v883_v34 = vadd.f32 %v882_v25, %v881_v19  ;;  %v1255_v35 = vadd.f32 %v1254_v56, %v1253_v22 }
 0x3a3   : > { %907 = vadd.xlane.f32.xlu1 %v906_v32  ;;  %v897_v36 = vsel %vm802_vm1, %v893_v33, 0.0  ;;  %v1263_v37 = vrot.slane %v1262_v29, 2  ;;  %v1275_v38 = vrot.slane %v1274_v30, 4  ;;  %v1268_v39 = vrot.slane %v1267_v31, 4 }
 0x3a4   : > { %898 = vadd.xlane.f32.xlu0 %v897_v36  ;;  %v884_v40 = vrot.slane %v883_v34, 1  ;;  %v1256_v41 = vrot.slane %v1255_v35, 2  ;;  %v2306_v10 = vmov 0  }
 0x3a5   : > { %v1264_v42 = vadd.f32 %v1263_v37, %v1262_v29  ;;  %v1276_v43 = vadd.f32 %v1275_v38, %v1274_v30  ;;  %v1269_v44 = vadd.f32 %v1268_v39, %v1267_v31 }
 0x3a6   : > { %v885_v45 = vadd.f32 %v884_v40, %v883_v34  ;;  %v1257_v46 = vadd.f32 %v1256_v41, %v1255_v35 }
 0x3a7   : > { %v1265_v47 = vrot.slane %v1264_v42, 1  ;;  %v1277_v48 = vrot.slane %v1276_v43, 2  ;;  %v1270_v49 = vrot.slane %v1269_v44, 2 }
 0x3a8   : > { %v895_v51 = vsel %vm2609_vm2, %v885_v45, 0.0  ;;  %v1258_v54 = vrot.slane %v1257_v46, 1 }
 0x3a9   : > { %v903_v55 = vsel %vm802_vm1, %v895_v51, 0.0  ;;  %v1266_v58 = vadd.f32 %v1265_v47, %v1264_v42  ;;  %v1278_v59 = vadd.f32 %v1277_v48, %v1276_v43  ;;  %v1271_v60 = vadd.f32 %v1270_v49, %v1269_v44 }
 0x3aa   : > { %904 = vadd.xlane.f32.xlu0 %v903_v55  ;;  %v1259_v61 = vadd.f32 %v1258_v54, %v1257_v46 }
 0x3ab   : > { %v1282_v62 = vsel %vm2609_vm2, %v1266_v58, 0.0  ;;  %v1279_v63 = vrot.slane %v1278_v59, 1  ;;  %v1272_v0 = vrot.slane %v1271_v60, 1 }
 0x3ac   : > { %v1288_v1 = vsel %vm802_vm1, %v1282_v62, 0.0  ;;  %v1281_v50 = vsel %vm2609_vm2, %v1259_v61, 0.0 }
 0x3ad   : > { %1289 = vadd.xlane.f32.xlu1 %v1288_v1  ;;  %v1285_v2 = vsel %vm802_vm1, %v1281_v50, 0.0  ;;  %v1280_v3 = vadd.f32 %v1279_v63, %v1278_v59  ;;  %v2669_v4 = vadd.f32 %v1272_v0, %v1271_v60 }
 0x3ae   : > { %1286 = vadd.xlane.f32.xlu0 %v1285_v2 }
 0x3af   : > { %v1284_v5 = vsel %vm2609_vm2, %v1280_v3, 0.0  ;;  %v1283_v6 = vsel %vm2609_vm2, %v2669_v4, 0.0 }
 0x3b0   : > { %v1294_v8 = vsel %vm802_vm1, %v1284_v5, 0.0  ;;  %v1291_v9 = vsel %vm802_vm1, %v1283_v6, 0.0 }
 0x3b1   : > { %1295 = vadd.xlane.f32.xlu1 %v1294_v8 }
 0x3b2   : > { %1292 = vadd.xlane.f32.xlu0 %v1291_v9 }
 0x42c   : > { %v2678_v53 = vpop.xlane.xlu1 %901 }
 0x42d   : > { %vm1298_vm3 = vcmp.le.f32.partialorder %v2630_v7, %v2678_v53 }
 0x42e   : > { %v1302_v11 = vsel %vm1298_vm3, 1, %v2306_v10 }
 0x42f   : > { %v1318_v12 = vsel %vm802_vm1, %v1302_v11, 0 }
 0x430   : > { %v2683_v52 = vpop.xlane.xlu1 %907  ;;  %v1320_v14 = vshrl.u32 %v1318_v12, 16  ;;  %v1319_v16 = vand.u32 65535, %v1318_v12 }
 0x431   : > { %vm1300_vm4 = vcmp.le.f32.partialorder %v2643_v21, %v2683_v52  ;;  %v2687_v13 = vpop.xlane.xlu0 %898 }
 0x432   : > { %vm1297_vm5 = vcmp.le.f32.partialorder %v2648_v24, %v2687_v13  ;;  %v1322_v15 = vcvt.s32.f32 %v1320_v14  ;;  %v1304_v17 = vsel %vm1300_vm4, 1, %v2306_v10  ;;  %v1321_v57 = vcvt.s32.f32 %v1319_v16 }
 0x433   : > { %v1301_v18 = vsel %vm1297_vm5, 1, %v2306_v10  ;;  %v1344_v7 = vsel %vm802_vm1, %v1304_v17, 0  ;;  %vm2307_vm4 = vmmov 1  }
 0x434   : > { %1325 = vadd.xlane.f32.xlu1 %v1322_v15  ;;  %v1305_v19 = vsel %vm802_vm1, %v1301_v18, 0  ;;  %v1346_v22 = vshrl.u32 %v1344_v7, 16  ;;  %v1345_v29 = vand.u32 65535, %v1344_v7 }
 0x435   : > { %v1307_v20 = vshrl.u32 %v1305_v19, 16  ;;  %v1306_v25 = vand.u32 65535, %v1305_v19 }
 0x436   : > { %v1348_v28 = vcvt.s32.f32 %v1346_v22  ;;  %v1347_v38 = vcvt.s32.f32 %v1345_v29 }
 0x437   : > { %v2693_v23 = vpop.xlane.xlu0 %904  ;;  %v1309_v21 = vcvt.s32.f32 %v1307_v20  ;;  %v1308_v32 = vcvt.s32.f32 %v1306_v25 }
 0x438   : > { %vm1299_vm6 = vcmp.le.f32.partialorder %v885_v45, %v2693_v23  ;;  %1323 = vadd.xlane.f32.xlu1 %v1321_v57 }
 0x439   : > { %1312 = vadd.xlane.f32.xlu0 %v1309_v21  ;;  %v1303_v24 = vsel %vm1299_vm6, 1, %v2306_v10 }
 0x43a   : > { %v2696_v56 = vpop.xlane.xlu1 %1289  ;;  %v1331_v30 = vsel %vm802_vm1, %v1303_v24, 0 }
 0x43b   : > { %vm1394_vm7 = vcmp.le.f32.partialorder %v1266_v58, %v2696_v56  ;;  %v2700_v31 = vpop.xlane.xlu0 %1286  ;;  %v1333_v33 = vshrl.u32 %v1331_v30, 16  ;;  %v1332_v42 = vand.u32 65535, %v1331_v30 }
 0x43c   : > { %vm1393_vm8 = vcmp.le.f32.partialorder %v1259_v61, %v2700_v31  ;;  %1351 = vadd.xlane.f32.xlu1 %v1348_v28  ;;  %v1398_v34 = vsel %vm1394_vm7, 1, %v2306_v10 }
 0x43d   : > { %1310 = vadd.xlane.f32.xlu0 %v1308_v32  ;;  %v1414_v35 = vsel %vm802_vm1, %v1398_v34, 0  ;;  %v1397_v36 = vsel %vm1393_vm8, 1, %v2306_v10  ;;  %v1335_v41 = vcvt.s32.f32 %v1333_v33  ;;  %v1334_v47 = vcvt.s32.f32 %v1332_v42 }
 0x43e   : > { %v2704_v37 = vpop.xlane.xlu1 %1295  ;;  %v1416_v39 = vshrl.u32 %v1414_v35, 16  ;;  %v1401_v43 = vsel %vm802_vm1, %v1397_v36, 0  ;;  %v1415_v46 = vand.u32 65535, %v1414_v35 }
 0x43f   : > { %vm1396_vm9 = vcmp.le.f32.partialorder %v1280_v3, %v2704_v37  ;;  %v2707_v40 = vpop.xlane.xlu0 %1292  ;;  %v1403_v48 = vshrl.u32 %v1401_v43, 16  ;;  %v1402_v59 = vand.u32 65535, %v1401_v43 }
 0x440   : > { %1349 = vadd.xlane.f32.xlu1 %v1347_v38  ;;  %v1400_v44 = vsel %vm1396_vm9, 1, %v2306_v10  ;;  %vm1395_vm10 = vcmp.le.f32.partialorder %v2669_v4, %v2707_v40  ;;  %v1418_v45 = vcvt.s32.f32 %v1416_v39  ;;  %v1417_v54 = vcvt.s32.f32 %v1415_v46 }
 0x441   : > { %1338 = vadd.xlane.f32.xlu0 %v1335_v41  ;;  %v1440_v49 = vsel %vm802_vm1, %v1400_v44, 0  ;;  %v1399_v51 = vsel %vm1395_vm10, 1, %v2306_v10  ;;  %v1405_v58 = vcvt.s32.f32 %v1403_v48  ;;  %v1404_v63 = vcvt.s32.f32 %v1402_v59 }
 0x442   : > { %v1442_v55 = vshrl.u32 %v1440_v49, 16  ;;  %v1427_v60 = vsel %vm802_vm1, %v1399_v51, 0  ;;  %v1441_v62 = vand.u32 65535, %v1440_v49 }
 0x443   : > { %v1429_v0 = vshrl.u32 %v1427_v60, 16  ;;  %v1428_v2 = vand.u32 65535, %v1427_v60 }
 0x444   : > { %1421 = vadd.xlane.f32.xlu1 %v1418_v45  ;;  %v1444_v61 = vcvt.s32.f32 %v1442_v55  ;;  %v1443_v1 = vcvt.s32.f32 %v1441_v62 }
 0x445   : > { %1336 = vadd.xlane.f32.xlu0 %v1334_v47  ;;  %v1431_v50 = vcvt.s32.f32 %v1429_v0  ;;  %v1430_v3 = vcvt.s32.f32 %v1428_v2 }
 0x448   : > { %1419 = vadd.xlane.f32.xlu1 %v1417_v54 }
 0x449   : > { %1408 = vadd.xlane.f32.xlu0 %v1405_v58 }
 0x44c   : > { %1447 = vadd.xlane.f32.xlu1 %v1444_v61 }
 0x44d   : > { %1406 = vadd.xlane.f32.xlu0 %v1404_v63 }
 0x450   : > { %1445 = vadd.xlane.f32.xlu1 %v1443_v1 }
 0x451   : > { %1434 = vadd.xlane.f32.xlu0 %v1431_v50 }
 0x455   : > { %1432 = vadd.xlane.f32.xlu0 %v1430_v3 }
 0x4c1   : > { %v1326_v4 = vpop.xlane.xlu1 %1325 }
 0x4c2   : > { %v1328_v5 = vcvt.f32.s32 %v1326_v4 }
 0x4c4   : > { %v1329_v8 = vshll.u32 %v1328_v5, 16 }
 0x4c5   : > { %v1324_v6 = vpop.xlane.xlu1 %1323 }
 0x4c6   : > { %v1327_v9 = vcvt.f32.s32 %v1324_v6  ;;  %v1313_v10 = vpop.xlane.xlu0 %1312 }
 0x4c7   : > { %v1315_v11 = vcvt.f32.s32 %v1313_v10 }
 0x4c8   : > { %v1330_v12 = vadd.s32 %v1329_v8, %v1327_v9 }
 0x4c9   : > { %v1352_v14 = vpop.xlane.xlu1 %1351  ;;  %v1316_v18 = vshll.u32 %v1315_v11, 16 }
 0x4ca   : > { %vm1358_vm11 = vcmp.ge.s32.totalorder %v1330_v12, 4  ;;  %v1354_v15 = vcvt.f32.s32 %v1352_v14  ;;  %v1311_v16 = vpop.xlane.xlu0 %1310 }
 0x4cb   : > { %v1362_v17 = vsel %vm1358_vm11, %v2678_v53, 3e+38  ;;  %v1314_v7 = vcvt.f32.s32 %v1311_v16 }
 0x4cc   : > { %v1371_v19 = vrot.slane %v1362_v17, 4  ;;  %v1355_v22 = vshll.u32 %v1354_v15, 16 }
 0x4cd   : > { %v1317_v20 = vadd.s32 %v1316_v18, %v1314_v7  ;;  %v1350_v57 = vpop.xlane.xlu1 %1349 }
 0x4ce   : > { %v1353_v21 = vcvt.f32.s32 %v1350_v57  ;;  %v1339_v25 = vpop.xlane.xlu0 %1338  ;;  %v1372_v30 = vmin.f32 %v1362_v17, %v1371_v19 }
 0x4cf   : > { %vm1357_vm12 = vcmp.ge.s32.totalorder %v1317_v20, 4  ;;  %v1341_v24 = vcvt.f32.s32 %v1339_v25 }
 0x4d0   : > { %v1361_v28 = vsel %vm1357_vm12, %v2687_v13, 3e+38  ;;  %v1356_v29 = vadd.s32 %v1355_v22, %v1353_v21  ;;  %v1373_v42 = vrot.slane %v1372_v30, 2 }
 0x4d1   : > { %v1365_v32 = vrot.slane %v1361_v28, 4  ;;  %v1422_v33 = vpop.xlane.xlu1 %1421  ;;  %v1342_v38 = vshll.u32 %v1341_v24, 16 }
 0x4d2   : > { %vm1360_vm13 = vcmp.ge.s32.totalorder %v1356_v29, 4  ;;  %v1424_v34 = vcvt.f32.s32 %v1422_v33  ;;  %v1337_v35 = vpop.xlane.xlu0 %1336  ;;  %v1374_v58 = vmin.f32 %v1372_v30, %v1373_v42 }
 0x4d3   : > { %v1364_v36 = vsel %vm1360_vm13, %v2683_v52, 3e+38  ;;  %v1340_v39 = vcvt.f32.s32 %v1337_v35  ;;  %v1366_v43 = vmin.f32 %v1361_v28, %v1365_v32 }
 0x4d4   : > { %v1383_v41 = vrot.slane %v1364_v36, 4  ;;  %v1425_v47 = vshll.u32 %v1424_v34, 16  ;;  %v1375_v4 = vrot.slane %v1374_v58, 1 }
 0x4d5   : > { %v1343_v44 = vadd.s32 %v1342_v38, %v1340_v39  ;;  %v1420_v45 = vpop.xlane.xlu1 %1419  ;;  %v1367_v59 = vrot.slane %v1366_v43, 2 }
 0x4d6   : > { %v1384_v46 = vmin.f32 %v1364_v36, %v1383_v41  ;;  %v1423_v48 = vcvt.f32.s32 %v1420_v45  ;;  %v1409_v49 = vpop.xlane.xlu0 %1408  ;;  %v1376_v19 = vmin.f32 %v1374_v58, %v1375_v4 }
 0x4d7   : > { %vm1359_vm14 = vcmp.ge.s32.totalorder %v1343_v44, 4  ;;  %v1411_v51 = vcvt.f32.s32 %v1409_v49  ;;  %v1368_v5 = vmin.f32 %v1366_v43, %v1367_v59 }
 0x4d8   : > { %v1363_v54 = vsel %vm1359_vm14, %v2693_v23, 3e+38  ;;  %v1426_v55 = vadd.s32 %v1425_v47, %v1423_v48  ;;  %v1385_v60 = vrot.slane %v1384_v46, 2  ;;  %vm1390_vm2 = vcmp.le.f32.partialorder %v2678_v53, %v1376_v19 }
 0x4d9   : > { %v1448_v61 = vpop.xlane.xlu1 %1447  ;;  %v1377_v62 = vrot.slane %v1363_v54, 4  ;;  %v1412_v50 = vshll.u32 %v1411_v51, 16  ;;  %v1369_v20 = vrot.slane %v1368_v5, 1  ;;  %vm1498_vm5 = vmxor %vm1390_vm2, %vm2307_vm4 }
 0x4da   : > { %vm1454_vm15 = vcmp.ge.s32.totalorder %v1426_v55, 4  ;;  %v1450_v63 = vcvt.f32.s32 %v1448_v61  ;;  %v1407_v0 = vpop.xlane.xlu0 %1406  ;;  %v1386_v6 = vmin.f32 %v1384_v46, %v1385_v60 }
 0x4db   : > { %v1458_v1 = vsel %vm1454_vm15, %v2696_v56, 3e+38  ;;  %v1410_v2 = vcvt.f32.s32 %v1407_v0  ;;  %v1378_v10 = vmin.f32 %v1363_v54, %v1377_v62  ;;  %v1370_v35 = vmin.f32 %v1368_v5, %v1369_v20 }
 0x4dc   : > { %v1467_v3 = vrot.slane %v1458_v1, 4  ;;  %v1451_v12 = vshll.u32 %v1450_v63, 16  ;;  %v1387_v22 = vrot.slane %v1386_v6, 1 }
 0x4dd   : > { %v1413_v8 = vadd.s32 %v1412_v50, %v1410_v2  ;;  %v1446_v9 = vpop.xlane.xlu1 %1445  ;;  %v1379_v21 = vrot.slane %v1378_v10, 2  ;;  %vm1389_vm7 = vcmp.le.f32.partialorder %v2687_v13, %v1370_v35 }
 0x4de   : > { %v1468_v11 = vmin.f32 %v1458_v1, %v1467_v3  ;;  %v1449_v14 = vcvt.f32.s32 %v1446_v9  ;;  %v1435_v15 = vpop.xlane.xlu0 %1434  ;;  %v1388_v39 = vmin.f32 %v1386_v6, %v1387_v22  ;;  %vm2737_vm12 = vmxor %vm1389_vm7, %vm2307_vm4  ;;  %v2100_v9 = vld [vmem:[%s2543_s17 + $0x18] sm:$0xff] }
 0x4df   : > { %vm1453_vm0 = vcmp.ge.s32.totalorder %v1413_v8, 4  ;;  %v1437_v16 = vcvt.f32.s32 %v1435_v15  ;;  %v1380_v41 = vmin.f32 %v1378_v10, %v1379_v21 }
 0x4e0   : > { %v1469_v17 = vrot.slane %v1468_v11, 2  ;;  %v1457_v18 = vsel %vm1453_vm0, %v2700_v31, 3e+38  ;;  %v1452_v7 = vadd.s32 %v1451_v12, %v1449_v14  ;;  %vm1392_vm9 = vcmp.le.f32.partialorder %v2683_v52, %v1388_v39 }
 0x4e1   : > { %v1461_v57 = vrot.slane %v1457_v18, 4  ;;  %v1438_v30 = vshll.u32 %v1437_v16, 16  ;;  %v1381_v49 = vrot.slane %v1380_v41, 1  ;;  %vm2747_vm13 = vmxor %vm1392_vm9, %vm2307_vm4 }
 0x4e2   : > { %v1470_v25 = vmin.f32 %v1468_v11, %v1469_v17  ;;  %vm1456_vm1 = vcmp.ge.s32.totalorder %v1452_v7, 4  ;;  %v1433_v24 = vpop.xlane.xlu0 %1432  ;;  %v2102_v7 = vld [vmem:[%s2543_s17 + $0x10] sm:$0xff] }
 0x4e3   : > { %v1462_v28 = vmin.f32 %v1457_v18, %v1461_v57  ;;  %v1460_v29 = vsel %vm1456_vm1, %v2704_v37, 3e+38  ;;  %v1436_v32 = vcvt.f32.s32 %v1433_v24  ;;  %v1382_v0 = vmin.f32 %v1380_v41, %v1381_v49  ;;  %v2101_v18 = vld [vmem:[%s2535_s15 + $0x10] sm:$0xff] }
 0x4e4   : > { %v1471_v33 = vrot.slane %v1470_v25, 1  ;;  %v1479_v34 = vrot.slane %v1460_v29, 4 }
 0x4e5   : > { %v1463_v36 = vrot.slane %v1462_v28, 2  ;;  %v1439_v38 = vadd.s32 %v1438_v30, %v1436_v32 }
 0x4e6   : > { %v1472_v42 = vmin.f32 %v1470_v25, %v1471_v33  ;;  %v1480_v43 = vmin.f32 %v1460_v29, %v1479_v34 }
 0x4e7   : > { %v1464_v44 = vmin.f32 %v1462_v28, %v1463_v36  ;;  %vm1455_vm3 = vcmp.ge.s32.totalorder %v1439_v38, 4 }
 0x4e8   : > { %vm1486_vm6 = vcmp.le.f32.partialorder %v2696_v56, %v1472_v42  ;;  %v1481_v45 = vrot.slane %v1480_v43, 2  ;;  %v1459_v46 = vsel %vm1455_vm3, %v2707_v40, 3e+38 }
 0x4e9   : > { %vm1490_vm8 = vmxor %vm1486_vm6, %vm2307_vm4  ;;  %v1465_v47 = vrot.slane %v1464_v44, 1  ;;  %v1473_v48 = vrot.slane %v1459_v46, 4 }
 0x4ea   : > { %vm1494_vm10 = vmand %vm1390_vm2, %vm1490_vm8  ;;  %v1482_v51 = vmin.f32 %v1480_v43, %v1481_v45 }
 0x4eb   : > { %vm1502_vm11 = vmand %vm1486_vm6, %vm1498_vm5  ;;  %v1514_v56 = vsel %vm1494_vm10, %v2559_v27, %v2556_v26  ;;  %v1466_v54 = vmin.f32 %v1464_v44, %v1465_v47  ;;  %v1474_v55 = vmin.f32 %v1459_v46, %v1473_v48  ;;  %vm1391_vm5 = vcmp.le.f32.partialorder %v2693_v23, %v1382_v0 }
 0x4ec   : > { %v1526_v59 = vsel %vm1502_vm11, %v2556_v26, %v2559_v27  ;;  %v1530_v53 = vadd.f32 %v1514_v56, %v2556_v26  ;;  %v1483_v60 = vrot.slane %v1482_v51, 1  ;;  %vm1499_vm8 = vmxor %vm1391_vm5, %vm2307_vm4 }
 0x4ed   : > { %v1542_v62 = vadd.f32 %v1526_v59, %v2559_v27  ;;  %vm1485_vm14 = vcmp.le.f32.partialorder %v2700_v31, %v1466_v54  ;;  %v1475_v63 = vrot.slane %v1474_v55, 2  ;;  %v2097_v27 = vld [vmem:[%s2535_s15] sm:$0xff] }
 0x4ee   : > { %v1534_v1 = vmul.f32 0.5, %v1530_v53  ;;  %vm1489_vm15 = vmxor %vm1485_vm14, %vm2307_vm4  ;;  %v1484_v26 = vmin.f32 %v1482_v51, %v1483_v60  ;;  %v2098_v31 = vld [vmem:[%s2543_s17] sm:$0xff] }
 0x4ef   : > { %v1546_v50 = vmul.f32 0.5, %v1542_v62  ;;  %vm1493_vm0 = vmand %vm1389_vm7, %vm1489_vm15  ;;  %v1476_v2 = vmin.f32 %v1474_v55, %v1475_v63 }
 0x4f0   : > { %1538 = vst [vmem:[%s2757_s23 + $0x8] sm:$0xff] %v1534_v1  ;;  %vm1501_vm1 = vmand %vm1485_vm14, %vm2737_vm12  ;;  %v1513_v3 = vsel %vm1493_vm0, %v2098_v31, %v2097_v27  ;;  %vm1488_vm2 = vcmp.le.f32.partialorder %v2704_v37, %v1484_v26  ;;  %v2099_v37 = vld [vmem:[%s2535_s15 + $0x18] sm:$0xff]  ;;  %s2195_s15 = sshll.u32 %s2308_s14, 4  ;;  %s2196_s15 = int_to_ptr.vmem [resolvable:$false] %s2195_s15 }
 0x4f1   : > { %1550 = vst [vmem:[%s2766_s13 + $0x8] sm:$0xff] %v1546_v50  ;;  %v1525_v13 = vsel %vm1501_vm1, %v2097_v27, %v2098_v31  ;;  %v1529_v4 = vadd.f32 %v2097_v27, %v1513_v3  ;;  %vm1492_vm3 = vmxor %vm1488_vm2, %vm2307_vm4  ;;  %v1477_v5 = vrot.slane %v1476_v2, 1  ;;  %s2197_s26 = scalar_lea.vmem %s2196_s15, 1024  ;;  %p2198_p1 = scmp.lt.s32.totalorder %s2798_s29, %s2196_s15 }
 0x4f2   : > { %v1541_v6 = vadd.f32 %v2098_v31, %v1525_v13  ;;  %vm1496_vm6 = vmand %vm1392_vm9, %vm1492_vm3  ;;  %p2199_p5 = scmp.lt.s32.totalorder %s2197_s26, %s2191_s12 }
 0x4f3   : > { %v1533_v8 = vmul.f32 0.5, %v1529_v4  ;;  %vm1504_vm7 = vmand %vm1488_vm2, %vm2747_vm13  ;;  %v1516_v10 = vsel %vm1496_vm6, %v2100_v9, %v2099_v37  ;;  %v1478_v11 = vmin.f32 %v1476_v2, %v1477_v5 }
 0x4f4   : > { %v1545_v12 = vmul.f32 0.5, %v1541_v6  ;;  %v1528_v14 = vsel %vm1504_vm7, %v2099_v37, %v2100_v9  ;;  %v1532_v15 = vadd.f32 %v2099_v37, %v1516_v10  ;;  %p2200_p2 = por %p2199_p5, %p2198_p1 }
 0x4f5   : > { %1537 = vst [vmem:[%s2757_s23] sm:$0xff] %v1533_v8  ;;  %v1544_v52 = vadd.f32 %v2100_v9, %v1528_v14  ;;  %vm1487_vm9 = vcmp.le.f32.partialorder %v2707_v40, %v1478_v11 }
 0x4f6   : > { %1549 = vst [vmem:[%s2766_s13] sm:$0xff] %v1545_v12  ;;  %v1536_v16 = vmul.f32 0.5, %v1532_v15  ;;  %vm1491_vm10 = vmxor %vm1487_vm9, %vm2307_vm4  ;;  %p2201_p6 = pnand %p2200_p2, %p2194_p9 }
 0x4f7   : > { %v1548_v17 = vmul.f32 0.5, %v1544_v52  ;;  %vm1495_vm11 = vmand %vm1391_vm5, %vm1491_vm10 }
 0x4f8   : > { %1540 = vst [vmem:[%s2757_s23 + $0x18] sm:$0xff] %v1536_v16  ;;  %vm1503_vm12 = vmand %vm1487_vm9, %vm1499_vm8  ;;  %v1515_v19 = vsel %vm1495_vm11, %v2102_v7, %v2101_v18 }
 0x4f9   : > { %1552 = vst [vmem:[%s2766_s13 + $0x18] sm:$0xff] %v1548_v17  ;;  %v1527_v40 = vsel %vm1503_vm12, %v2101_v18, %v2102_v7  ;;  %v1531_v20 = vadd.f32 %v2101_v18, %v1515_v19 }
 0x4fa   : > { %v1543_v23 = vadd.f32 %v2102_v7, %v1527_v40 }
 0x4fb   : > { %v1535_v57 = vmul.f32 0.5, %v1531_v20 }
 0x4fc   : > { %v1547_v22 = vmul.f32 0.5, %v1543_v23 }
 0x4fd   : > { %1539 = vst [vmem:[%s2757_s23 + $0x10] sm:$0xff] %v1535_v57 }
 0x4fe   : > { %1551 = vst [vmem:[%s2766_s13 + $0x10] sm:$0xff] %v1547_v22 }
 0x4ff   : > { %2204 = shalt.err (!%p2201_p6)
}
 0x500   : > { %s2205_s27 = scalar_lea.hbm %s2795_s22, 512  ;;  %s2209_s8 = scalar_lea.hbm %s2885_s4, 1024 }
 0x501   : > { %p2206_p8 = scmp.ne.s32.totalorder %s2795_s22, %s2205_s27  ;;  %p2210_p4 = scmp.lt.u32.totalorder %s2795_s22, %s2885_s4 }
 0x502   : > { %p2211_p11 = scmp.lt.u32.totalorder %s2209_s8, %s2205_s27  ;;  %p2213_p3 = scmp.lt.u32.totalorder %s2205_s27, %s2795_s22 }
 0x503   : > { %p2207_p10 = pnand %p2206_p8, %p2436_p12 }
 0x504   : > { %p2212_p13 = por %p2211_p11, %p2210_p4 }
 0x505   : > { %p2208_p0 = pneg %p2207_p10 }
 0x506   : > { %p2214_p7 = por %p2213_p3, %p2212_p13 }
 0x508   : > { %p2215_p9 = pnand %p2214_p7, %p2208_p0 }
 0x50a   : > { %2218 = shalt.err (!%p2215_p9)
}
 0x50b   : > { %s2309_s6 = smov 128   ;;  %s2310_s16 = smov 8  }
 0x50c   : > { %1998 = dma.vmem_to_hbm [thread:$0]  (%p2436_p12), %s2798_s29, 512, %s2795_s22, %s1554_s0, %s2309_s6, %s2309_s6, %s2310_s16  }
 0x50d   : > { %s1559_s10 = scalar_lea.sflag [#allocation10], %s2528_s20  ;;  %s2219_s11 = scalar_lea.vmem %s2805_s2, 512 }
 0x50e   : > { %p2220_p1 = scmp.ne.s32.totalorder %s2805_s2, %s2219_s11  ;;  %s2311_s28 = smov [#allocation9]  }
 0x50f   : > { %s2223_s12 = sshll.u32 %s2311_s28, 4  ;;  %s2224_s12 = int_to_ptr.vmem [resolvable:$false] %s2223_s12 }
 0x510   : > { %p2221_p5 = pnand %p2220_p1, %p2436_p12  ;;  %s2225_s14 = scalar_lea.vmem %s2224_s12, 1024 }
 0x511   : > { %p2226_p6 = scmp.lt.s32.totalorder %s2805_s2, %s2224_s12  ;;  %p2227_p8 = scmp.lt.s32.totalorder %s2225_s14, %s2219_s11 }
 0x512   : > { %p2222_p2 = pneg %p2221_p5 }
 0x513   : > { %p2228_p10 = por %p2227_p8, %p2226_p6 }
 0x515   : > { %p2229_p0 = pnand %p2228_p10, %p2222_p2 }
 0x517   : > { %2232 = shalt.err (!%p2229_p0)
}
 0x518   : > { %s2233_s29 = scalar_lea.hbm %s2803_s7, 512  ;;  %s2237_s15 = scalar_lea.hbm %s2886_s5, 1024 }
 0x519   : > { %p2234_p4 = scmp.ne.s32.totalorder %s2803_s7, %s2233_s29  ;;  %p2238_p3 = scmp.lt.u32.totalorder %s2803_s7, %s2886_s5 }
 0x51a   : > { %p2239_p7 = scmp.lt.u32.totalorder %s2237_s15, %s2233_s29  ;;  %p2241_p1 = scmp.lt.u32.totalorder %s2233_s29, %s2803_s7 }
 0x51b   : > { %p2235_p11 = pnand %p2234_p4, %p2436_p12 }
 0x51c   : > { %p2240_p9 = por %p2239_p7, %p2238_p3 }
 0x51d   : > { %p2236_p13 = pneg %p2235_p11 }
 0x51e   : > { %p2242_p5 = por %p2241_p1, %p2240_p9 }
 0x520   : > { %p2243_p2 = pnand %p2242_p5, %p2236_p13 }
 0x522   : > { %2246 = shalt.err (!%p2243_p2)
}
 0x523   : > { %1999 = dma.vmem_to_hbm [thread:$0]  (%p2436_p12), %s2805_s2, 512, %s2803_s7, %s1559_s10, %s2309_s6, %s2309_s6, %s2310_s16  }
 0x524 PF: > { %s1603_s17 = sand.u32 1, %s2285_s18   ;;  %p2920_p6 = scmp.ne.s32.totalorder %s2899_s25, 0 }
 0x525   : > { %p2921_p8 = scmp.ge.s32.totalorder %s2297_s21, 2  ;;  %s1604_s24 = scalar_lea.sflag [#allocation4], %s1603_s17 }
 0x527   : > { %p2014_p10 = pnand %p2921_p8, %p2920_p6 }
 0x529   : > { %2276 = dma.done.wait (!%p2014_p10), %s1604_s24, 512  }
 0x52a   : > { %2278 = vsyncadd (!%p2014_p10), %s1604_s24, 4294966784  ;;  %s1613_s9 = scalar_lea.sflag [#allocation10], %s1603_s17 }
 0x52b   : > { %2280 = dma.done.wait (!%p2014_p10), %s1613_s9, 512  }
 0x52c   : > { %2282 = vsyncadd (!%p2014_p10), %s1613_s9, 4294966784  ;;  %s2922_s20 = sld [smem:[#allocation16_spill]]  ;;  %s2923_s8 = sld [smem:[#allocation17_spill]] }
 0x52d   : > { %p25_p12 = scmp.ge.s32.totalorder %s2398_s30, 4   ;;  %s2924_s18 = smov %s2289_s19 }
 0x52e   : > { %s2927_s21 = smov %s2398_s30 }
 0x52f   :  { %27 = sbr.rel (!%p25_p12) target bundleno = 12 (0xc), region = 115 }
 0x532   : > { %s2925_s19 = smov %s2922_s20  ;;  %s2926_s20 = smov %s2923_s8 }
 0x536   :  { %1618 = vsyncpa [#allocation3], 1 }
 0x537   :  { %1620 = vsyncpa [#allocation3 + $0x1], 1 }
 0x538   :  { %1621 = vsyncpa [#allocation6], 1 }
 0x539   :  { %1623 = vsyncpa [#allocation6 + $0x1], 1 }
 0x53a   :  { %1624 = vsyncpa [#allocation4], 1 }
 0x53b   :  { %1626 = vsyncpa [#allocation4 + $0x1], 1 }
 0x53c   :  { %1627 = vsyncpa [#allocation10], 1 }
 0x53d   :  { %1629 = vsyncpa [#allocation10 + $0x1], 1 }

</bundles_post_ra>
